<compile_context>
chip_gen: v5e
topology: v5e:2x2
jax: 0.10.0
libtpu: 0.0.40
codegen_flags: <defaults>
</compile_context>

<pallas_src>
import functools

import jax
import jax.numpy as jnp
from jax import lax
from jax.experimental import pallas as pl
from jax.experimental.pallas import tpu as pltpu
import numpy as np


# ----------------------------- Pallas kernel -------------------------------


def _layernorm(h, gamma, beta, eps=1e-5):
    mu = jnp.mean(h, axis=-1, keepdims=True)
    var = jnp.mean((h - mu) ** 2, axis=-1, keepdims=True)
    return (h - mu) * lax.rsqrt(var + eps) * gamma + beta


def _muse_kernel(d_ref, x_ref, seln_ref, selc_ref, cnt_ref,
                 w1_ref, w2_ref, w3_ref, p_ref, out_ref,
                 *, C, H, H2, out_w):
    f32 = jnp.float32

    # ---- span path: lane-dense (bm, 4*N*C) slab, reductions on the MXU ----
    d = d_ref[...]                                                      # (bm, 4NC) f32
    # per-(group,class) sums; masked spans are all-zero rows so they add 0
    num4 = jnp.dot(d, selc_ref[...], preferred_element_type=f32)        # (bm, 4C)
    # per-(group,span) |.| sums -> span mask
    abs_span = jnp.dot(jnp.abs(d), seln_ref[...],
                       preferred_element_type=f32)                      # (bm, 4N)
    maskf = (abs_span != 0.0).astype(f32)
    # per-group span counts, broadcast across that group's C lanes
    den4 = jnp.dot(maskf, cnt_ref[...], preferred_element_type=f32)     # (bm, 4C)
    means4 = num4 / jnp.maximum(den4, 1.0)        # [pm | a0m | a1m | fxm] lanes
    y_span = (means4[:, 0 * C:1 * C] + means4[:, 1 * C:2 * C]
              + means4[:, 2 * C:3 * C] + means4[:, 3 * C:4 * C]) * 0.25

    # ---- sentence path: Linear -> LN -> ReLU -> Linear -> LN -> ReLU -> Linear
    # TODO(synk): dropout layers are identity here (eval-mode semantics).
    p = p_ref[...]                                                      # (8, Hmax) f32
    b1, g1, be1 = p[0:1, :H], p[1:2, :H], p[2:3, :H]
    b2, g2, be2 = p[3:4, :H2], p[4:5, :H2], p[5:6, :H2]
    b3 = p[6:7, :C]

    h1 = jnp.dot(x_ref[...], w1_ref[...], preferred_element_type=f32) + b1
    h1 = jnp.maximum(_layernorm(h1, g1, be1), 0.0)
    h2 = jnp.dot(h1.astype(w2_ref.dtype), w2_ref[...],
                 preferred_element_type=f32) + b2
    h2 = jnp.maximum(_layernorm(h2, g2, be2), 0.0)
    y_sent = jnp.dot(h2.astype(w3_ref.dtype), w3_ref[...],
                     preferred_element_type=f32) + b3

    combined = y_span + y_sent

    # ---- single lane-dense output slab, one unmasked full-tile store ------
    bm = d.shape[0]
    pad = jnp.zeros((bm, out_w - 7 * C), f32)
    out_ref[...] = jnp.concatenate([y_span, y_sent, combined, means4, pad],
                                   axis=-1)


# ------------------------------ wrapper ------------------------------------


def _make_selectors(N, C):
    """Static 0/1 selector matrices for the lane-dense span reduction."""
    NC = N * C
    selN = np.zeros((4 * NC, 4 * N), np.float32)   # sum over classes per span
    selC = np.zeros((4 * NC, 4 * C), np.float32)   # sum over spans per class
    j = np.arange(4 * NC)
    g, n, c = j // NC, (j % NC) // C, j % C
    selN[j, g * N + n] = 1.0
    selC[j, g * C + c] = 1.0
    cnt = np.zeros((4 * N, 4 * C), np.float32)     # span count -> per-class lanes
    k = np.arange(4 * N)
    gk = k // N
    for cc in range(C):
        cnt[k, gk * C + cc] = 1.0
    return selN, selC, cnt


@functools.partial(jax.jit, static_argnames=("concat_frameaxis", "matmul_dtype"))
def muse_supervised_alt2_forward(d_p, d_a0, d_a1, d_fx, vs, frameaxis_data,
                                 params, concat_frameaxis=True,
                                 matmul_dtype=jnp.float32):
    B, S, A, C = d_p.shape
    N = S * A
    NC = N * C
    f32 = jnp.float32

    (w1, b1, g1, be1, w2, b2, g2, be2, w3, b3) = params
    H = w1.shape[1]
    H2 = w2.shape[1]
    Hmax = max(H, H2, C)

    # batch tile (>= 8-sublane granule, capped; production: 128-256 per review)
    bm = min(128, ((B + 7) // 8) * 8)
    Bp = ((B + bm - 1) // bm) * bm

    # --- lane-dense span slab: (Bp, 4*N*C) -- pure reshape/concat/pad -------
    d_fx_full = jnp.pad(d_fx, ((0, 0), (0, N - S), (0, 0)))      # (B, N, C)
    d_all = jnp.concatenate(
        [d_p.reshape(B, NC), d_a0.reshape(B, NC),
         d_a1.reshape(B, NC), d_fx_full.reshape(B, NC)], axis=-1).astype(f32)
    d_all = jnp.pad(d_all, ((0, Bp - B), (0, 0)))                # (Bp, 4NC)

    # --- sentence-path input: concat vs/frameaxis here (fuses with pad) -----
    xs = jnp.concatenate([vs, frameaxis_data], axis=-1) if concat_frameaxis else vs
    Dx = S * xs.shape[-1]
    x = jnp.pad(xs.reshape(B, Dx), ((0, Bp - B), (0, 0))).astype(matmul_dtype)

    w1m = w1.astype(matmul_dtype)
    w2m = w2.astype(matmul_dtype)
    w3m = w3.astype(matmul_dtype)

    # --- selector constants (resident across the batch grid) ----------------
    selN_np, selC_np, cnt_np = _make_selectors(N, C)
    selN = jnp.asarray(selN_np)
    selC = jnp.asarray(selC_np)
    cnt = jnp.asarray(cnt_np)

    # --- pack the 7 small parameter vectors into one (8, Hmax) slab ---------
    def row(v):
        v = v.reshape(-1).astype(f32)
        return jnp.pad(v, (0, Hmax - v.shape[0]))

    pvec = jnp.stack([row(b1), row(g1), row(be1),
                      row(b2), row(g2), row(be2),
                      row(b3), jnp.zeros((Hmax,), f32)], axis=0)

    out_w = max(128, ((7 * C + 127) // 128) * 128)

    kernel = functools.partial(_muse_kernel, C=C, H=H, H2=H2, out_w=out_w)

    resident = lambda shape: pl.BlockSpec(shape, lambda i: (0, 0))
    batched = lambda width: pl.BlockSpec((bm, width), lambda i: (i, 0))

    out = pl.pallas_call(
        kernel,
        out_shape=jax.ShapeDtypeStruct((Bp, out_w), f32),
        grid=(Bp // bm,),
        in_specs=[
            batched(4 * NC),            # d slab   (batch-tiled)
            batched(Dx),                # x        (batch-tiled)
            resident(selN.shape),       # selectors / weights: fetched once
            resident(selC.shape),
            resident(cnt.shape),
            resident(w1m.shape),
            resident(w2m.shape),
            resident(w3m.shape),
            resident(pvec.shape),
        ],
        out_specs=batched(out_w),
        compiler_params=pltpu.CompilerParams(
            dimension_semantics=("parallel",),
            vmem_limit_bytes=32 * 1024 * 1024),
    )(d_all, x, selN, selC, cnt, w1m, w2m, w3m, pvec)

    y_span = out[:B, 0 * C:1 * C]
    y_sent = out[:B, 1 * C:2 * C]
    combined = out[:B, 2 * C:3 * C]
    other = {
        "predicate": out[:B, 3 * C:4 * C],
        "arg0": out[:B, 4 * C:5 * C],
        "arg1": out[:B, 5 * C:6 * C],
        "frameaxis": out[:B, 6 * C:7 * C],
    }
    return y_span, y_sent, combined, other


# -------------------------- pure-JAX reference ------------------------------


def reference_forward(d_p, d_a0, d_a1, d_fx, vs, frameaxis_data, params,
                      concat_frameaxis=True):
    B, S, A, C = d_p.shape

    def mm(x):
        m = (jnp.abs(x).sum(-1) != 0).astype(jnp.float32)
        return (x * m[..., None]).sum(1) / jnp.maximum(m.sum(1, keepdims=True), 1.0)

    d_p_mean = mm(d_p.reshape(B, S * A, C))
    d_a0_mean = mm(d_a0.reshape(B, S * A, C))
    d_a1_mean = mm(d_a1.reshape(B, S * A, C))
    d_fx_mean = mm(d_fx)
    y_span = (d_p_mean + d_a0_mean + d_a1_mean + d_fx_mean) / 4.0

    if concat_frameaxis:
        vs = jnp.concatenate([vs, frameaxis_data], axis=-1)
    x = vs.reshape(B, -1)
    (w1, b1, g1, be1, w2, b2, g2, be2, w3, b3) = params

    def ln(h, g, b):
        mu = h.mean(-1, keepdims=True)
        var = ((h - mu) ** 2).mean(-1, keepdims=True)
        return (h - mu) / jnp.sqrt(var + 1e-5) * g + b

    h1 = jnp.maximum(ln(x @ w1 + b1, g1, be1), 0.0)
    h2 = jnp.maximum(ln(h1 @ w2 + b2, g2, be2), 0.0)
    y_sent = h2 @ w3 + b3
    other = {"predicate": d_p_mean, "arg0": d_a0_mean,
             "arg1": d_a1_mean, "frameaxis": d_fx_mean}
    return y_span, y_sent, y_span + y_sent, other


# --------------------------------- main -------------------------------------


if __name__ == "__main__":
    batch = 2
    num_sentences = 8
    num_args = 4
    num_classes = 8
    embedding_dim = 32
    frameaxis_dim = 16
    hidden_dim = 64
    concat_frameaxis = True
    D_h = embedding_dim + (frameaxis_dim if concat_frameaxis else 0)

    key = jax.random.PRNGKey(0)
    keys = jax.random.split(key, 12)

    d_p = jax.random.normal(keys[0], (batch, num_sentences, num_args, num_classes), jnp.float32)
    d_a0 = jax.random.normal(keys[1], (batch, num_sentences, num_args, num_classes), jnp.float32)
    d_a1 = jax.random.normal(keys[2], (batch, num_sentences, num_args, num_classes), jnp.float32)
    d_fx = jax.random.normal(keys[3], (batch, num_sentences, num_classes), jnp.float32)
    vs = jax.random.normal(keys[4], (batch, num_sentences, embedding_dim), jnp.float32)
    frameaxis_data = jax.random.normal(keys[5], (batch, num_sentences, frameaxis_dim), jnp.float32)

    # zero out some spans/sentences/batches to exercise masking + den clamp
    d_p = d_p.at[:, :, 2:, :].set(0.0)
    d_a0 = d_a0.at[:, 3:, :, :].set(0.0)
    d_fx = d_fx.at[:, 5:, :].set(0.0)
    d_a1 = d_a1.at[1].set(0.0)

    def init_linear(k, fan_in, fan_out):
        w = jax.random.normal(k, (fan_in, fan_out), jnp.float32) / jnp.sqrt(fan_in)
        b = jnp.zeros((1, fan_out), jnp.float32)
        return w, b

    w1, b1 = init_linear(keys[6], D_h * num_sentences, hidden_dim)
    g1, be1 = jnp.ones((1, hidden_dim), jnp.float32), jnp.zeros((1, hidden_dim), jnp.float32)
    w2, b2 = init_linear(keys[7], hidden_dim, hidden_dim // 2)
    g2, be2 = jnp.ones((1, hidden_dim // 2), jnp.float32), jnp.zeros((1, hidden_dim // 2), jnp.float32)
    w3, b3 = init_linear(keys[8], hidden_dim // 2, num_classes)
    params = (w1, b1, g1, be1, w2, b2, g2, be2, w3, b3)

    r_span, r_sent, r_comb, r_other = reference_forward(
        d_p, d_a0, d_a1, d_fx, vs, frameaxis_data, params,
        concat_frameaxis=concat_frameaxis)

    # ---- f32 matmul path (default): tight check vs the f32 reference -------
    y_span, y_sent, combined, other = muse_supervised_alt2_forward(
        d_p, d_a0, d_a1, d_fx, vs, frameaxis_data, params,
        concat_frameaxis=concat_frameaxis)
    jax.block_until_ready(combined)

    np.testing.assert_allclose(np.asarray(y_span), np.asarray(r_span), rtol=1e-4, atol=1e-4)
    np.testing.assert_allclose(np.asarray(y_sent), np.asarray(r_sent), rtol=1e-4, atol=1e-4)
    np.testing.assert_allclose(np.asarray(combined), np.asarray(r_comb), rtol=1e-4, atol=1e-4)
    for k in ("predicate", "arg0", "arg1", "frameaxis"):
        np.testing.assert_allclose(np.asarray(other[k]), np.asarray(r_other[k]),
                                   rtol=1e-4, atol=1e-4)

    # ---- bf16 matmul-operand path (v6e/v7x production mode): loose check ----
    y_span_b, y_sent_b, combined_b, other_b = muse_supervised_alt2_forward(
        d_p, d_a0, d_a1, d_fx, vs, frameaxis_data, params,
        concat_frameaxis=concat_frameaxis, matmul_dtype=jnp.bfloat16)
    jax.block_until_ready(combined_b)

    np.testing.assert_allclose(np.asarray(y_span_b), np.asarray(r_span), rtol=1e-4, atol=1e-4)
    np.testing.assert_allclose(np.asarray(other_b["predicate"]),
                               np.asarray(r_other["predicate"]), rtol=1e-4, atol=1e-4)
    np.testing.assert_allclose(np.asarray(y_sent_b), np.asarray(r_sent), rtol=0.1, atol=0.1)
    np.testing.assert_allclose(np.asarray(combined_b), np.asarray(r_comb), rtol=0.1, atol=0.1)

    print("KERNEL_OK")
</pallas_src>

<mosaic_0001>
module attributes {stable_mosaic.version = 11 : i64} {
  func.func @_muse_kernel(%arg0: i32, %arg1: memref<8x1024xf32, #tpu.memory_space<vmem>>, %arg2: memref<8x384xf32, #tpu.memory_space<vmem>>, %arg3: memref<1024x128xf32, #tpu.memory_space<vmem>>, %arg4: memref<1024x32xf32, #tpu.memory_space<vmem>>, %arg5: memref<128x32xf32, #tpu.memory_space<vmem>>, %arg6: memref<384x64xf32, #tpu.memory_space<vmem>>, %arg7: memref<64x32xf32, #tpu.memory_space<vmem>>, %arg8: memref<32x8xf32, #tpu.memory_space<vmem>>, %arg9: memref<8x64xf32, #tpu.memory_space<vmem>>, %arg10: memref<8x128xf32, #tpu.memory_space<vmem>>) attributes {dimension_semantics = [#tpu.dimension_semantics<parallel>], iteration_bounds = array<i64: 1>, scalar_prefetch = 0 : i64, scratch_operands = 0 : i64, tpu.core_type = #tpu.core_type<tc>, window_params = [{transform_indices = @transform_0, window_bounds = array<i64: 8, 1024>}, {transform_indices = @transform_1, window_bounds = array<i64: 8, 384>}, {pipeline_mode = #tpu.pipeline_mode<synchronous>, transform_indices = @transform_2, window_bounds = array<i64: 1024, 128>}, {pipeline_mode = #tpu.pipeline_mode<synchronous>, transform_indices = @transform_3, window_bounds = array<i64: 1024, 32>}, {pipeline_mode = #tpu.pipeline_mode<synchronous>, transform_indices = @transform_4, window_bounds = array<i64: 128, 32>}, {pipeline_mode = #tpu.pipeline_mode<synchronous>, transform_indices = @transform_5, window_bounds = array<i64: 384, 64>}, {pipeline_mode = #tpu.pipeline_mode<synchronous>, transform_indices = @transform_6, window_bounds = array<i64: 64, 32>}, {pipeline_mode = #tpu.pipeline_mode<synchronous>, transform_indices = @transform_7, window_bounds = array<i64: 32, 8>}, {pipeline_mode = #tpu.pipeline_mode<synchronous>, transform_indices = @transform_8, window_bounds = array<i64: 8, 64>}, {transform_indices = @transform_9, window_bounds = array<i64: 8, 128>}]} {
    %c0 = arith.constant 0 : index
    %c0_0 = arith.constant 0 : index
    %0 = vector.load %arg1[%c0, %c0_0] : memref<8x1024xf32, #tpu.memory_space<vmem>>, vector<8x1024xf32>
    %c0_1 = arith.constant 0 : index
    %c0_2 = arith.constant 0 : index
    %1 = vector.load %arg4[%c0_1, %c0_2] : memref<1024x32xf32, #tpu.memory_space<vmem>>, vector<1024x32xf32>
    %cst = arith.constant dense<0.000000e+00> : vector<8x32xf32>
    %2 = tpu.matmul %0, %1, %cst {dimension_numbers = #tpu.dot_dimension_numbers<[1], [0], [0], [1], [0, 0, 1, 1], [], []>} : vector<8x1024xf32>, vector<1024x32xf32>, vector<8x32xf32> -> vector<8x32xf32>
    %3 = math.absf %0 : vector<8x1024xf32>
    %c0_3 = arith.constant 0 : index
    %c0_4 = arith.constant 0 : index
    %4 = vector.load %arg3[%c0_3, %c0_4] : memref<1024x128xf32, #tpu.memory_space<vmem>>, vector<1024x128xf32>
    %cst_5 = arith.constant dense<0.000000e+00> : vector<8x128xf32>
    %5 = tpu.matmul %3, %4, %cst_5 {dimension_numbers = #tpu.dot_dimension_numbers<[1], [0], [0], [1], [0, 0, 1, 1], [], []>} : vector<8x1024xf32>, vector<1024x128xf32>, vector<8x128xf32> -> vector<8x128xf32>
    %cst_6 = arith.constant 0.000000e+00 : f32
    %6 = vector.broadcast %cst_6 : f32 to vector<8x128xf32>
    %7 = arith.cmpf one, %5, %6 : vector<8x128xf32>
    %8 = arith.extui %7 : vector<8x128xi1> to vector<8x128xi32>
    %9 = arith.sitofp %8 : vector<8x128xi32> to vector<8x128xf32>
    %c0_7 = arith.constant 0 : index
    %c0_8 = arith.constant 0 : index
    %10 = vector.load %arg5[%c0_7, %c0_8] : memref<128x32xf32, #tpu.memory_space<vmem>>, vector<128x32xf32>
    %cst_9 = arith.constant dense<0.000000e+00> : vector<8x32xf32>
    %11 = tpu.matmul %9, %10, %cst_9 {dimension_numbers = #tpu.dot_dimension_numbers<[1], [0], [0], [1], [0, 0, 1, 1], [], []>} : vector<8x128xf32>, vector<128x32xf32>, vector<8x32xf32> -> vector<8x32xf32>
    %cst_10 = arith.constant 1.000000e+00 : f32
    %12 = vector.broadcast %cst_10 : f32 to vector<8x32xf32>
    %13 = arith.maximumf %11, %12 : vector<8x32xf32>
    %14 = arith.divf %2, %13 : vector<8x32xf32>
    %15 = vector.extract_strided_slice %14 {offsets = [0, 0], sizes = [8, 8], strides = [1, 1]} : vector<8x32xf32> to vector<8x8xf32>
    %16 = vector.extract_strided_slice %14 {offsets = [0, 8], sizes = [8, 8], strides = [1, 1]} : vector<8x32xf32> to vector<8x8xf32>
    %17 = arith.addf %15, %16 : vector<8x8xf32>
    %18 = vector.extract_strided_slice %14 {offsets = [0, 16], sizes = [8, 8], strides = [1, 1]} : vector<8x32xf32> to vector<8x8xf32>
    %19 = arith.addf %17, %18 : vector<8x8xf32>
    %20 = vector.extract_strided_slice %14 {offsets = [0, 24], sizes = [8, 8], strides = [1, 1]} : vector<8x32xf32> to vector<8x8xf32>
    %21 = arith.addf %19, %20 : vector<8x8xf32>
    %cst_11 = arith.constant 2.500000e-01 : f32
    %22 = vector.broadcast %cst_11 : f32 to vector<8x8xf32>
    %23 = arith.mulf %21, %22 : vector<8x8xf32>
    %c0_12 = arith.constant 0 : index
    %c0_13 = arith.constant 0 : index
    %24 = vector.load %arg9[%c0_12, %c0_13] : memref<8x64xf32, #tpu.memory_space<vmem>>, vector<8x64xf32>
    %25 = vector.extract_strided_slice %24 {offsets = [0, 0], sizes = [1, 64], strides = [1, 1]} : vector<8x64xf32> to vector<1x64xf32>
    %26 = vector.extract_strided_slice %24 {offsets = [1, 0], sizes = [1, 64], strides = [1, 1]} : vector<8x64xf32> to vector<1x64xf32>
    %27 = vector.extract_strided_slice %24 {offsets = [2, 0], sizes = [1, 64], strides = [1, 1]} : vector<8x64xf32> to vector<1x64xf32>
    %28 = vector.extract_strided_slice %24 {offsets = [3, 0], sizes = [1, 32], strides = [1, 1]} : vector<8x64xf32> to vector<1x32xf32>
    %29 = vector.extract_strided_slice %24 {offsets = [4, 0], sizes = [1, 32], strides = [1, 1]} : vector<8x64xf32> to vector<1x32xf32>
    %30 = vector.extract_strided_slice %24 {offsets = [5, 0], sizes = [1, 32], strides = [1, 1]} : vector<8x64xf32> to vector<1x32xf32>
    %31 = vector.extract_strided_slice %24 {offsets = [6, 0], sizes = [1, 8], strides = [1, 1]} : vector<8x64xf32> to vector<1x8xf32>
    %c0_14 = arith.constant 0 : index
    %c0_15 = arith.constant 0 : index
    %32 = vector.load %arg2[%c0_14, %c0_15] : memref<8x384xf32, #tpu.memory_space<vmem>>, vector<8x384xf32>
    %c0_16 = arith.constant 0 : index
    %c0_17 = arith.constant 0 : index
    %33 = vector.load %arg6[%c0_16, %c0_17] : memref<384x64xf32, #tpu.memory_space<vmem>>, vector<384x64xf32>
    %cst_18 = arith.constant dense<0.000000e+00> : vector<8x64xf32>
    %34 = tpu.matmul %32, %33, %cst_18 {dimension_numbers = #tpu.dot_dimension_numbers<[1], [0], [0], [1], [0, 0, 1, 1], [], []>} : vector<8x384xf32>, vector<384x64xf32>, vector<8x64xf32> -> vector<8x64xf32>
    %35 = vector.broadcast %25 : vector<1x64xf32> to vector<8x64xf32>
    %36 = arith.addf %34, %35 : vector<8x64xf32>
    %cst_19 = arith.constant dense<0.000000e+00> : vector<8xf32>
    %37 = vector.multi_reduction <add>, %36, %cst_19 [1] : vector<8x64xf32> to vector<8xf32>
    %38 = vector.shape_cast %37 : vector<8xf32> to vector<8x1xf32>
    %cst_20 = arith.constant 6.400000e+01 : f32
    %39 = vector.broadcast %cst_20 : f32 to vector<8x1xf32>
    %40 = arith.divf %38, %39 : vector<8x1xf32>
    %41 = vector.broadcast %40 : vector<8x1xf32> to vector<8x64xf32>
    %42 = arith.subf %36, %41 : vector<8x64xf32>
    %43 = arith.mulf %42, %42 : vector<8x64xf32>
    %cst_21 = arith.constant dense<0.000000e+00> : vector<8xf32>
    %44 = vector.multi_reduction <add>, %43, %cst_21 [1] : vector<8x64xf32> to vector<8xf32>
    %45 = vector.shape_cast %44 : vector<8xf32> to vector<8x1xf32>
    %cst_22 = arith.constant 6.400000e+01 : f32
    %46 = vector.broadcast %cst_22 : f32 to vector<8x1xf32>
    %47 = arith.divf %45, %46 : vector<8x1xf32>
    %48 = vector.broadcast %40 : vector<8x1xf32> to vector<8x64xf32>
    %49 = arith.subf %36, %48 : vector<8x64xf32>
    %cst_23 = arith.constant 9.99999974E-6 : f32
    %50 = vector.broadcast %cst_23 : f32 to vector<8x1xf32>
    %51 = arith.addf %47, %50 : vector<8x1xf32>
    %52 = math.rsqrt %51 : vector<8x1xf32>
    %53 = vector.broadcast %52 : vector<8x1xf32> to vector<8x64xf32>
    %54 = arith.mulf %49, %53 : vector<8x64xf32>
    %55 = vector.broadcast %26 : vector<1x64xf32> to vector<8x64xf32>
    %56 = arith.mulf %54, %55 : vector<8x64xf32>
    %57 = vector.broadcast %27 : vector<1x64xf32> to vector<8x64xf32>
    %58 = arith.addf %56, %57 : vector<8x64xf32>
    %cst_24 = arith.constant 0.000000e+00 : f32
    %59 = vector.broadcast %cst_24 : f32 to vector<8x64xf32>
    %60 = arith.maximumf %58, %59 : vector<8x64xf32>
    %c0_25 = arith.constant 0 : index
    %c0_26 = arith.constant 0 : index
    %61 = vector.load %arg7[%c0_25, %c0_26] : memref<64x32xf32, #tpu.memory_space<vmem>>, vector<64x32xf32>
    %cst_27 = arith.constant dense<0.000000e+00> : vector<8x32xf32>
    %62 = tpu.matmul %60, %61, %cst_27 {dimension_numbers = #tpu.dot_dimension_numbers<[1], [0], [0], [1], [0, 0, 1, 1], [], []>} : vector<8x64xf32>, vector<64x32xf32>, vector<8x32xf32> -> vector<8x32xf32>
    %63 = vector.broadcast %28 : vector<1x32xf32> to vector<8x32xf32>
    %64 = arith.addf %62, %63 : vector<8x32xf32>
    %cst_28 = arith.constant dense<0.000000e+00> : vector<8xf32>
    %65 = vector.multi_reduction <add>, %64, %cst_28 [1] : vector<8x32xf32> to vector<8xf32>
    %66 = vector.shape_cast %65 : vector<8xf32> to vector<8x1xf32>
    %cst_29 = arith.constant 3.200000e+01 : f32
    %67 = vector.broadcast %cst_29 : f32 to vector<8x1xf32>
    %68 = arith.divf %66, %67 : vector<8x1xf32>
    %69 = vector.broadcast %68 : vector<8x1xf32> to vector<8x32xf32>
    %70 = arith.subf %64, %69 : vector<8x32xf32>
    %71 = arith.mulf %70, %70 : vector<8x32xf32>
    %cst_30 = arith.constant dense<0.000000e+00> : vector<8xf32>
    %72 = vector.multi_reduction <add>, %71, %cst_30 [1] : vector<8x32xf32> to vector<8xf32>
    %73 = vector.shape_cast %72 : vector<8xf32> to vector<8x1xf32>
    %cst_31 = arith.constant 3.200000e+01 : f32
    %74 = vector.broadcast %cst_31 : f32 to vector<8x1xf32>
    %75 = arith.divf %73, %74 : vector<8x1xf32>
    %76 = vector.broadcast %68 : vector<8x1xf32> to vector<8x32xf32>
    %77 = arith.subf %64, %76 : vector<8x32xf32>
    %cst_32 = arith.constant 9.99999974E-6 : f32
    %78 = vector.broadcast %cst_32 : f32 to vector<8x1xf32>
    %79 = arith.addf %75, %78 : vector<8x1xf32>
    %80 = math.rsqrt %79 : vector<8x1xf32>
    %81 = vector.broadcast %80 : vector<8x1xf32> to vector<8x32xf32>
    %82 = arith.mulf %77, %81 : vector<8x32xf32>
    %83 = vector.broadcast %29 : vector<1x32xf32> to vector<8x32xf32>
    %84 = arith.mulf %82, %83 : vector<8x32xf32>
    %85 = vector.broadcast %30 : vector<1x32xf32> to vector<8x32xf32>
    %86 = arith.addf %84, %85 : vector<8x32xf32>
    %cst_33 = arith.constant 0.000000e+00 : f32
    %87 = vector.broadcast %cst_33 : f32 to vector<8x32xf32>
    %88 = arith.maximumf %86, %87 : vector<8x32xf32>
    %c0_34 = arith.constant 0 : index
    %c0_35 = arith.constant 0 : index
    %89 = vector.load %arg8[%c0_34, %c0_35] : memref<32x8xf32, #tpu.memory_space<vmem>>, vector<32x8xf32>
    %cst_36 = arith.constant dense<0.000000e+00> : vector<8x8xf32>
    %90 = tpu.matmul %88, %89, %cst_36 {dimension_numbers = #tpu.dot_dimension_numbers<[1], [0], [0], [1], [0, 0, 1, 1], [], []>} : vector<8x32xf32>, vector<32x8xf32>, vector<8x8xf32> -> vector<8x8xf32>
    %91 = vector.broadcast %31 : vector<1x8xf32> to vector<8x8xf32>
    %92 = arith.addf %90, %91 : vector<8x8xf32>
    %93 = arith.addf %23, %92 : vector<8x8xf32>
    %cst_37 = arith.constant 0.000000e+00 : f32
    %94 = vector.broadcast %cst_37 : f32 to vector<8x72xf32>
    %95 = tpu.concatenate %23, %92, %93, %14, %94 in 1 : vector<8x8xf32>, vector<8x8xf32>, vector<8x8xf32>, vector<8x32xf32>, vector<8x72xf32> -> vector<8x128xf32>
    %c0_38 = arith.constant 0 : index
    %c0_39 = arith.constant 0 : index
    %96 = vector.load %arg10[%c0_38, %c0_39] : memref<8x128xf32, #tpu.memory_space<vmem>>, vector<8x128xf32>
    tpu.vector_store %arg10[%c0_38, %c0_39], %95 {strides = array<i32>} : memref<8x128xf32, #tpu.memory_space<vmem>>, vector<8x128xf32>,
    return
  }
  func.func @transform_0(%arg0: i32) -> (i32, i32) {
    %c0_i32 = arith.constant 0 : i32
    %c0_i32_0 = arith.constant 0 : i32
    return %arg0, %c0_i32 : i32, i32
  }
  func.func @transform_1(%arg0: i32) -> (i32, i32) {
    %c0_i32 = arith.constant 0 : i32
    %c0_i32_0 = arith.constant 0 : i32
    return %arg0, %c0_i32 : i32, i32
  }
  func.func @transform_2(%arg0: i32) -> (i32, i32) {
    %c0_i32 = arith.constant 0 : i32
    %c0_i32_0 = arith.constant 0 : i32
    %c0_i32_1 = arith.constant 0 : i32
    return %c0_i32, %c0_i32_0 : i32, i32
  }
  func.func @transform_3(%arg0: i32) -> (i32, i32) {
    %c0_i32 = arith.constant 0 : i32
    %c0_i32_0 = arith.constant 0 : i32
    %c0_i32_1 = arith.constant 0 : i32
    return %c0_i32, %c0_i32_0 : i32, i32
  }
  func.func @transform_4(%arg0: i32) -> (i32, i32) {
    %c0_i32 = arith.constant 0 : i32
    %c0_i32_0 = arith.constant 0 : i32
    %c0_i32_1 = arith.constant 0 : i32
    return %c0_i32, %c0_i32_0 : i32, i32
  }
  func.func @transform_5(%arg0: i32) -> (i32, i32) {
    %c0_i32 = arith.constant 0 : i32
    %c0_i32_0 = arith.constant 0 : i32
    %c0_i32_1 = arith.constant 0 : i32
    return %c0_i32, %c0_i32_0 : i32, i32
  }
  func.func @transform_6(%arg0: i32) -> (i32, i32) {
    %c0_i32 = arith.constant 0 : i32
    %c0_i32_0 = arith.constant 0 : i32
    %c0_i32_1 = arith.constant 0 : i32
    return %c0_i32, %c0_i32_0 : i32, i32
  }
  func.func @transform_7(%arg0: i32) -> (i32, i32) {
    %c0_i32 = arith.constant 0 : i32
    %c0_i32_0 = arith.constant 0 : i32
    %c0_i32_1 = arith.constant 0 : i32
    return %c0_i32, %c0_i32_0 : i32, i32
  }
  func.func @transform_8(%arg0: i32) -> (i32, i32) {
    %c0_i32 = arith.constant 0 : i32
    %c0_i32_0 = arith.constant 0 : i32
    %c0_i32_1 = arith.constant 0 : i32
    return %c0_i32, %c0_i32_0 : i32, i32
  }
  func.func @transform_9(%arg0: i32) -> (i32, i32) {
    %c0_i32 = arith.constant 0 : i32
    %c0_i32_0 = arith.constant 0 : i32
    return %arg0, %c0_i32 : i32, i32
  }
}

</mosaic_0001>

<bundles_post_ra>
// kernel: muse_supervised_alt2_forward.1
= control target key start
LH: loop header
LB: loop body
LE: loop exit
PB: predicated region body
PF: predicated region fallthrough
CT: control target
= control target key end

     0   :  { %14 = vsyncpa [#allocation3], 0  ;;  %s1468_s0 = inlined_call_operand.vmem [shape: f32[8,1024], index: 0, kind: input, shape index: {}]   ;;  %s1469_s1 = inlined_call_operand.vmem [shape: f32[8,384], index: 1, kind: input, shape index: {}]   ;;  %s1470_s2 = inlined_call_operand.hbm [shape: f32[1024,128], index: 2, kind: input, shape index: {}]   ;;  %s1471_s3 = inlined_call_operand.hbm [shape: f32[1024,32], index: 3, kind: input, shape index: {}]   ;;  %s1472_s4 = inlined_call_operand.vmem [shape: f32[128,32], index: 4, kind: input, shape index: {}]   ;;  %s1473_s5 = inlined_call_operand.vmem [shape: f32[384,64], index: 5, kind: input, shape index: {}]   ;;  %s1474_s6 = inlined_call_operand.vmem [shape: f32[64,32], index: 6, kind: input, shape index: {}]   ;;  %s1475_s7 = inlined_call_operand.vmem [shape: f32[32,8], index: 7, kind: input, shape index: {}]   ;;  %s1476_s8 = inlined_call_operand.vmem [shape: f32[8,64], index: 8, kind: input, shape index: {}]   ;;  %s1477_s9 = inlined_call_operand.vmem [shape: f32[8,128], index: 9, kind: output, shape index: {}]  }
   0x1   :  { %s24_s11 = sshll.u32 %s1470_s2, 4  ;;  %s25_s11 = int_to_ptr.hbm [resolvable:$true] %s24_s11 }
   0x2   :  { %15 = vsyncpa [#allocation5], 0  ;;  %s1073_s12 = smov [#allocation2]   ;;  %s37_s16 = sshll.u32 %s1471_s3, 4  ;;  %s38_s16 = int_to_ptr.hbm [resolvable:$true] %s37_s16 }
   0x3   :  { %s26_s13 = sshll.u32 %s1073_s12, 4  ;;  %s1074_s17 = smov 128   ;;  %s27_s13 = int_to_ptr.vmem [resolvable:$true] %s26_s13 }
   0x4   :  { %s1075_s18 = smov 8   ;;  %s1076_s19 = smov [#allocation4]  }
   0x5   :  { %32 = dma.hbm_to_vmem [thread:$0]  %s25_s11, 16384, %s27_s13, [#allocation3], %s1074_s17, %s1074_s17, %s1075_s18  }
   0x6   :  { %s39_s20 = sshll.u32 %s1076_s19, 4  ;;  %s40_s20 = int_to_ptr.vmem [resolvable:$true] %s39_s20 }
   0x7   :  { %45 = dma.hbm_to_vmem [thread:$0]  %s38_s16, 16384, %s40_s20, [#allocation5], %s1074_s17, %s1074_s17, %s1075_s18  }
   0x8   :  { %1069 = dma.done.wait [#allocation3], 16384  }
   0x9   :  { %1070 = vsyncadd [#allocation3], 4294950912 }
   0xa   :  { %1071 = dma.done.wait [#allocation5], 16384  }
   0xb   :  { %1072 = vsyncadd [#allocation5], 4294950912  ;;  %v119_v0 = vld [vmem:[#allocation4 + $0x178] sm:$0xff]  ;;  %v118_v2 = vld [vmem:[#allocation4 + $0x170] sm:$0xff]  ;;  %vm838_vm1 = vcmask 523264   ;;  %s1081_s29 = smov 104  }
   0xc   :  { %v87_v1 = vld [vmem:[#allocation4 + $0x78] sm:$0xff]  ;;  %240 = vmatpush.msra.mxu2 %v119_v0  ;;  %v86_v4 = vld [vmem:[#allocation4 + $0x70] sm:$0xff]  ;;  %v117_v6 = vld [vmem:[#allocation4 + $0x168] sm:$0xff]  ;;  %vm905_vm10 = vcmask 261120   ;;  %s1084_s28 = smov 24   ;;  %vm980_vm15 = vcmask 64512  }
   0xd   :  { %200 = vmatpush.msra.mxu0 %v87_v1  ;;  %v135_v3 = vld [vmem:[#allocation4 + $0x1f8] sm:$0xff]  ;;  %v134_v7 = vld [vmem:[#allocation4 + $0x1f0] sm:$0xff]  ;;  %v85_v8 = vld [vmem:[#allocation4 + $0x68] sm:$0xff] }
   0xe   :  { %v103_v5 = vld [vmem:[#allocation4 + $0xf8] sm:$0xff]  ;;  %260 = vmatpush.msra.mxu3 %v135_v3  ;;  %241 = vmatpush.msra.mxu2 %v118_v2  ;;  %v102_v9 = vld [vmem:[#allocation4 + $0xf0] sm:$0xff]  ;;  %v133_v10 = vld [vmem:[#allocation4 + $0x1e8] sm:$0xff] }
   0xf   :  { %220 = vmatpush.msra.mxu1 %v103_v5  ;;  %201 = vmatpush.msra.mxu0 %v86_v4  ;;  %v116_v11 = vld [vmem:[#allocation4 + $0x160] sm:$0xff]  ;;  %v101_v13 = vld [vmem:[#allocation4 + $0xe8] sm:$0xff]  ;;  %v115_v16 = vld [vmem:[#allocation4 + $0x158] sm:$0xff] }
  0x10   :  { %261 = vmatpush.msra.mxu3 %v134_v7  ;;  %v84_v12 = vld [vmem:[#allocation4 + $0x60] sm:$0xff]  ;;  %242 = vmatpush.msra.mxu2 %v117_v6  ;;  %v83_v17 = vld [vmem:[#allocation4 + $0x58] sm:$0xff]  ;;  %v114_v20 = vld [vmem:[#allocation4 + $0x150] sm:$0xff] }
  0x11   :  { %221 = vmatpush.msra.mxu1 %v102_v9  ;;  %202 = vmatpush.msra.mxu0 %v85_v8  ;;  %v132_v14 = vld [vmem:[#allocation4 + $0x1e0] sm:$0xff]  ;;  %v131_v18 = vld [vmem:[#allocation4 + $0x1d8] sm:$0xff]  ;;  %v82_v21 = vld [vmem:[#allocation4 + $0x50] sm:$0xff] }
  0x12   :  { %v100_v15 = vld [vmem:[#allocation4 + $0xe0] sm:$0xff]  ;;  %262 = vmatpush.msra.mxu3 %v133_v10  ;;  %243 = vmatpush.msra.mxu2 %v116_v11  ;;  %v99_v19 = vld [vmem:[#allocation4 + $0xd8] sm:$0xff]  ;;  %v130_v22 = vld [vmem:[#allocation4 + $0x1d0] sm:$0xff] }
  0x13   :  { %222 = vmatpush.msra.mxu1 %v101_v13  ;;  %203 = vmatpush.msra.mxu0 %v84_v12  ;;  %v98_v23 = vld [vmem:[#allocation4 + $0xd0] sm:$0xff]  ;;  %v113_v24 = vld [vmem:[#allocation4 + $0x148] sm:$0xff]  ;;  %v112_v28 = vld [vmem:[#allocation4 + $0x140] sm:$0xff] }
  0x14   :  { %263 = vmatpush.msra.mxu3 %v132_v14  ;;  %244 = vmatpush.msra.mxu2 %v115_v16  ;;  %v81_v25 = vld [vmem:[#allocation4 + $0x48] sm:$0xff]  ;;  %v80_v29 = vld [vmem:[#allocation4 + $0x40] sm:$0xff]  ;;  %v111_v32 = vld [vmem:[#allocation4 + $0x138] sm:$0xff] }
  0x15   :  { %223 = vmatpush.msra.mxu1 %v100_v15  ;;  %204 = vmatpush.msra.mxu0 %v83_v17  ;;  %v129_v26 = vld [vmem:[#allocation4 + $0x1c8] sm:$0xff]  ;;  %v128_v30 = vld [vmem:[#allocation4 + $0x1c0] sm:$0xff]  ;;  %v79_v33 = vld [vmem:[#allocation4 + $0x38] sm:$0xff] }
  0x16   :  { %264 = vmatpush.msra.mxu3 %v131_v18  ;;  %245 = vmatpush.msra.mxu2 %v114_v20  ;;  %v97_v27 = vld [vmem:[#allocation4 + $0xc8] sm:$0xff]  ;;  %v96_v31 = vld [vmem:[#allocation4 + $0xc0] sm:$0xff]  ;;  %v127_v34 = vld [vmem:[#allocation4 + $0x1b8] sm:$0xff] }
  0x17   :  { %224 = vmatpush.msra.mxu1 %v99_v19  ;;  %205 = vmatpush.msra.mxu0 %v82_v21  ;;  %v95_v35 = vld [vmem:[#allocation4 + $0xb8] sm:$0xff]  ;;  %v110_v36 = vld [vmem:[#allocation4 + $0x130] sm:$0xff]  ;;  %v109_v40 = vld [vmem:[#allocation4 + $0x128] sm:$0xff] }
  0x18   :  { %265 = vmatpush.msra.mxu3 %v130_v22  ;;  %246 = vmatpush.msra.mxu2 %v113_v24  ;;  %v78_v37 = vld [vmem:[#allocation4 + $0x30] sm:$0xff]  ;;  %v77_v41 = vld [vmem:[#allocation4 + $0x28] sm:$0xff]  ;;  %v108_v44 = vld [vmem:[#allocation4 + $0x120] sm:$0xff] }
  0x19   :  { %225 = vmatpush.msra.mxu1 %v98_v23  ;;  %206 = vmatpush.msra.mxu0 %v81_v25  ;;  %v126_v38 = vld [vmem:[#allocation4 + $0x1b0] sm:$0xff]  ;;  %v125_v42 = vld [vmem:[#allocation4 + $0x1a8] sm:$0xff]  ;;  %v76_v45 = vld [vmem:[#allocation4 + $0x20] sm:$0xff] }
  0x1a   :  { %266 = vmatpush.msra.mxu3 %v129_v26  ;;  %247 = vmatpush.msra.mxu2 %v112_v28  ;;  %v94_v39 = vld [vmem:[#allocation4 + $0xb0] sm:$0xff]  ;;  %v93_v43 = vld [vmem:[#allocation4 + $0xa8] sm:$0xff]  ;;  %v124_v46 = vld [vmem:[#allocation4 + $0x1a0] sm:$0xff] }
  0x1b   :  { %226 = vmatpush.msra.mxu1 %v97_v27  ;;  %207 = vmatpush.msra.mxu0 %v80_v29  ;;  %v92_v47 = vld [vmem:[#allocation4 + $0xa0] sm:$0xff]  ;;  %v107_v48 = vld [vmem:[#allocation4 + $0x118] sm:$0xff]  ;;  %v106_v52 = vld [vmem:[#allocation4 + $0x110] sm:$0xff] }
  0x1c   :  { %267 = vmatpush.msra.mxu3 %v128_v30  ;;  %248 = vmatpush.msra.mxu2 %v111_v32  ;;  %v75_v49 = vld [vmem:[#allocation4 + $0x18] sm:$0xff]  ;;  %v74_v53 = vld [vmem:[#allocation4 + $0x10] sm:$0xff]  ;;  %v105_v56 = vld [vmem:[#allocation4 + $0x108] sm:$0xff] }
  0x1d   :  { %227 = vmatpush.msra.mxu1 %v96_v31  ;;  %208 = vmatpush.msra.mxu0 %v79_v33  ;;  %v123_v50 = vld [vmem:[#allocation4 + $0x198] sm:$0xff]  ;;  %v122_v54 = vld [vmem:[#allocation4 + $0x190] sm:$0xff]  ;;  %v73_v57 = vld [vmem:[#allocation4 + $0x8] sm:$0xff] }
  0x1e   :  { %268 = vmatpush.msra.mxu3 %v127_v34  ;;  %249 = vmatpush.msra.mxu2 %v110_v36  ;;  %v91_v51 = vld [vmem:[#allocation4 + $0x98] sm:$0xff]  ;;  %v90_v55 = vld [vmem:[#allocation4 + $0x90] sm:$0xff]  ;;  %v121_v58 = vld [vmem:[#allocation4 + $0x188] sm:$0xff] }
  0x1f   :  { %228 = vmatpush.msra.mxu1 %v95_v35  ;;  %209 = vmatpush.msra.mxu0 %v78_v37  ;;  %v89_v59 = vld [vmem:[#allocation4 + $0x88] sm:$0xff]  ;;  %v104_v60 = vld [vmem:[#allocation4 + $0x100] sm:$0xff]  ;;  %v183_v62 = vld [vmem:[#allocation4 + $0x378] sm:$0xff] }
  0x20   :  { %269 = vmatpush.msra.mxu3 %v126_v38  ;;  %250 = vmatpush.msra.mxu2 %v109_v40  ;;  %v72_v61 = vld [vmem:[#allocation4] sm:$0xff]  ;;  %v151_v0 = vld [vmem:[#allocation4 + $0x278] sm:$0xff]  ;;  %v182_v2 = vld [vmem:[#allocation4 + $0x370] sm:$0xff] }
  0x21   :  { %229 = vmatpush.msra.mxu1 %v94_v39  ;;  %210 = vmatpush.msra.mxu0 %v77_v41  ;;  %v120_v63 = vld [vmem:[#allocation4 + $0x180] sm:$0xff]  ;;  %v199_v1 = vld [vmem:[#allocation4 + $0x3f8] sm:$0xff]  ;;  %v150_v4 = vld [vmem:[#allocation4 + $0x270] sm:$0xff] }
  0x22   :  { %270 = vmatpush.msra.mxu3 %v125_v42  ;;  %251 = vmatpush.msra.mxu2 %v108_v44  ;;  %v88_v3 = vld [vmem:[#allocation4 + $0x80] sm:$0xff]  ;;  %v167_v5 = vld [vmem:[#allocation4 + $0x2f8] sm:$0xff]  ;;  %v181_v6 = vld [vmem:[#allocation4 + $0x368] sm:$0xff] }
  0x23   :  { %230 = vmatpush.msra.mxu1 %v93_v43  ;;  %211 = vmatpush.msra.mxu0 %v76_v45  ;;  %v198_v7 = vld [vmem:[#allocation4 + $0x3f0] sm:$0xff]  ;;  %v149_v8 = vld [vmem:[#allocation4 + $0x268] sm:$0xff]  ;;  %v180_v10 = vld [vmem:[#allocation4 + $0x360] sm:$0xff] }
  0x24   :  { %271 = vmatpush.msra.mxu3 %v124_v46  ;;  %252 = vmatpush.msra.mxu2 %v107_v48  ;;  %v166_v9 = vld [vmem:[#allocation4 + $0x2f0] sm:$0xff]  ;;  %v197_v11 = vld [vmem:[#allocation4 + $0x3e8] sm:$0xff]  ;;  %v148_v12 = vld [vmem:[#allocation4 + $0x260] sm:$0xff] }
  0x25   :  { %231 = vmatpush.msra.mxu1 %v92_v47  ;;  %212 = vmatpush.msra.mxu0 %v75_v49  ;;  %v165_v13 = vld [vmem:[#allocation4 + $0x2e8] sm:$0xff]  ;;  %v179_v14 = vld [vmem:[#allocation4 + $0x358] sm:$0xff]  ;;  %v196_v15 = vld [vmem:[#allocation4 + $0x3e0] sm:$0xff] }
  0x26   :  { %272 = vmatpush.msra.mxu3 %v123_v50  ;;  %253 = vmatpush.msra.mxu2 %v106_v52  ;;  %v147_v16 = vld [vmem:[#allocation4 + $0x258] sm:$0xff]  ;;  %v164_v17 = vld [vmem:[#allocation4 + $0x2e0] sm:$0xff]  ;;  %v178_v18 = vld [vmem:[#allocation4 + $0x350] sm:$0xff] }
  0x27   :  { %232 = vmatpush.msra.mxu1 %v91_v51  ;;  %213 = vmatpush.msra.mxu0 %v74_v53  ;;  %v195_v19 = vld [vmem:[#allocation4 + $0x3d8] sm:$0xff]  ;;  %v146_v20 = vld [vmem:[#allocation4 + $0x250] sm:$0xff]  ;;  %v177_v22 = vld [vmem:[#allocation4 + $0x348] sm:$0xff] }
  0x28   :  { %273 = vmatpush.msra.mxu3 %v122_v54  ;;  %254 = vmatpush.msra.mxu2 %v105_v56  ;;  %v163_v21 = vld [vmem:[#allocation4 + $0x2d8] sm:$0xff]  ;;  %v194_v23 = vld [vmem:[#allocation4 + $0x3d0] sm:$0xff]  ;;  %v145_v24 = vld [vmem:[#allocation4 + $0x248] sm:$0xff] }
  0x29   :  { %233 = vmatpush.msra.mxu1 %v90_v55  ;;  %214 = vmatpush.msra.mxu0 %v73_v57  ;;  %v162_v25 = vld [vmem:[#allocation4 + $0x2d0] sm:$0xff]  ;;  %v176_v26 = vld [vmem:[#allocation4 + $0x340] sm:$0xff]  ;;  %v193_v27 = vld [vmem:[#allocation4 + $0x3c8] sm:$0xff] }
  0x2a   :  { %274 = vmatpush.msra.mxu3 %v121_v58  ;;  %255 = vmatpush.msra.mxu2 %v104_v60  ;;  %v144_v28 = vld [vmem:[#allocation4 + $0x240] sm:$0xff]  ;;  %v161_v29 = vld [vmem:[#allocation4 + $0x2c8] sm:$0xff]  ;;  %v175_v30 = vld [vmem:[#allocation4 + $0x338] sm:$0xff] }
  0x2b   :  { %234 = vmatpush.msra.mxu1 %v89_v59  ;;  %215 = vmatpush.msra.mxu0 %v72_v61  ;;  %v192_v31 = vld [vmem:[#allocation4 + $0x3c0] sm:$0xff]  ;;  %v143_v32 = vld [vmem:[#allocation4 + $0x238] sm:$0xff]  ;;  %v174_v34 = vld [vmem:[#allocation4 + $0x330] sm:$0xff] }
  0x2c   :  { %320 = vmatpush.msrb.mxu2 %v183_v62  ;;  %275 = vmatpush.msra.mxu3 %v120_v63  ;;  %v160_v33 = vld [vmem:[#allocation4 + $0x2c0] sm:$0xff]  ;;  %v191_v35 = vld [vmem:[#allocation4 + $0x3b8] sm:$0xff]  ;;  %v142_v36 = vld [vmem:[#allocation4 + $0x230] sm:$0xff] }
  0x2d   :  { %280 = vmatpush.msrb.mxu0 %v151_v0  ;;  %235 = vmatpush.msra.mxu1 %v88_v3  ;;  %v159_v37 = vld [vmem:[#allocation4 + $0x2b8] sm:$0xff]  ;;  %v173_v38 = vld [vmem:[#allocation4 + $0x328] sm:$0xff]  ;;  %v190_v39 = vld [vmem:[#allocation4 + $0x3b0] sm:$0xff] }
  0x2e   :  { %340 = vmatpush.msrb.mxu3 %v199_v1  ;;  %321 = vmatpush.msrb.mxu2 %v182_v2  ;;  %v141_v40 = vld [vmem:[#allocation4 + $0x228] sm:$0xff]  ;;  %v158_v41 = vld [vmem:[#allocation4 + $0x2b0] sm:$0xff]  ;;  %v172_v42 = vld [vmem:[#allocation4 + $0x320] sm:$0xff] }
  0x2f   :  { %281 = vmatpush.msrb.mxu0 %v150_v4  ;;  %300 = vmatpush.msrb.mxu1 %v167_v5  ;;  %v189_v43 = vld [vmem:[#allocation4 + $0x3a8] sm:$0xff]  ;;  %v140_v44 = vld [vmem:[#allocation4 + $0x220] sm:$0xff]  ;;  %v171_v46 = vld [vmem:[#allocation4 + $0x318] sm:$0xff] }
  0x30   :  { %322 = vmatpush.msrb.mxu2 %v181_v6  ;;  %341 = vmatpush.msrb.mxu3 %v198_v7  ;;  %v157_v45 = vld [vmem:[#allocation4 + $0x2a8] sm:$0xff]  ;;  %v188_v47 = vld [vmem:[#allocation4 + $0x3a0] sm:$0xff]  ;;  %v139_v48 = vld [vmem:[#allocation4 + $0x218] sm:$0xff] }
  0x31   :  { %282 = vmatpush.msrb.mxu0 %v149_v8  ;;  %301 = vmatpush.msrb.mxu1 %v166_v9  ;;  %v156_v49 = vld [vmem:[#allocation4 + $0x2a0] sm:$0xff]  ;;  %v170_v50 = vld [vmem:[#allocation4 + $0x310] sm:$0xff]  ;;  %v187_v51 = vld [vmem:[#allocation4 + $0x398] sm:$0xff] }
  0x32   :  { %323 = vmatpush.msrb.mxu2 %v180_v10  ;;  %342 = vmatpush.msrb.mxu3 %v197_v11  ;;  %v138_v52 = vld [vmem:[#allocation4 + $0x210] sm:$0xff]  ;;  %v155_v53 = vld [vmem:[#allocation4 + $0x298] sm:$0xff]  ;;  %v169_v54 = vld [vmem:[#allocation4 + $0x308] sm:$0xff] }
  0x33   :  { %283 = vmatpush.msrb.mxu0 %v148_v12  ;;  %302 = vmatpush.msrb.mxu1 %v165_v13  ;;  %v186_v55 = vld [vmem:[#allocation4 + $0x390] sm:$0xff]  ;;  %v137_v56 = vld [vmem:[#allocation4 + $0x208] sm:$0xff]  ;;  %v168_v58 = vld [vmem:[#allocation4 + $0x300] sm:$0xff] }
  0x34   :  { %324 = vmatpush.msrb.mxu2 %v179_v14  ;;  %343 = vmatpush.msrb.mxu3 %v196_v15  ;;  %v154_v57 = vld [vmem:[#allocation4 + $0x290] sm:$0xff]  ;;  %v185_v59 = vld [vmem:[#allocation4 + $0x388] sm:$0xff]  ;;  %v136_v61 = vld [vmem:[#allocation4 + $0x200] sm:$0xff] }
  0x35   :  { %284 = vmatpush.msrb.mxu0 %v147_v16  ;;  %303 = vmatpush.msrb.mxu1 %v164_v17  ;;  %v1146_v60 = vld [vmem:[%s1468_s0 + $0x10] sm:$0xff]  ;;  %v415_v62 = vld [vmem:[#allocation2 + $0x178] sm:$0xff]  ;;  %v153_v63 = vld [vmem:[#allocation4 + $0x288] sm:$0xff] }
  0x36   :  { %325 = vmatpush.msrb.mxu2 %v178_v18  ;;  %344 = vmatpush.msrb.mxu3 %v195_v19  ;;  %v184_v0 = vld [vmem:[#allocation4 + $0x380] sm:$0xff]  ;;  %v1157_v2 = vld [vmem:[%s1468_s0 + $0x18] sm:$0xff]  ;;  %v414_v4 = vld [vmem:[#allocation2 + $0x170] sm:$0xff] }
  0x37   :  { %285 = vmatpush.msrb.mxu0 %v146_v20  ;;  %304 = vmatpush.msrb.mxu1 %v163_v21  ;;  %v1151_v1 = vld [vmem:[%s1468_s0] sm:$0xff]  ;;  %v383_v3 = vld [vmem:[#allocation2 + $0x78] sm:$0xff]  ;;  %v382_v7 = vld [vmem:[#allocation2 + $0x70] sm:$0xff] }
  0x38   :  { %326 = vmatpush.msrb.mxu2 %v177_v22  ;;  %345 = vmatpush.msrb.mxu3 %v194_v23  ;;  %v431_v5 = vld [vmem:[#allocation2 + $0x1f8] sm:$0xff]  ;;  %v152_v6 = vld [vmem:[#allocation4 + $0x280] sm:$0xff]  ;;  %v1164_v8 = vld [vmem:[%s1468_s0 + $0x8] sm:$0xff] }
  0x39   :  { %286 = vmatpush.msrb.mxu0 %v145_v24  ;;  %305 = vmatpush.msrb.mxu1 %v162_v25  ;;  %v413_v9 = vld [vmem:[#allocation2 + $0x168] sm:$0xff]  ;;  %v399_v10 = vld [vmem:[#allocation2 + $0xf8] sm:$0xff]  ;;  %v430_v11 = vld [vmem:[#allocation2 + $0x1f0] sm:$0xff] }
  0x3a   :  { %327 = vmatpush.msrb.mxu2 %v176_v26  ;;  %346 = vmatpush.msrb.mxu3 %v193_v27  ;;  %v381_v12 = vld [vmem:[#allocation2 + $0x68] sm:$0xff]  ;;  %v412_v13 = vld [vmem:[#allocation2 + $0x160] sm:$0xff]  ;;  %v398_v14 = vld [vmem:[#allocation2 + $0xf0] sm:$0xff] }
  0x3b   :  { %287 = vmatpush.msrb.mxu0 %v144_v28  ;;  %306 = vmatpush.msrb.mxu1 %v161_v29  ;;  %v429_v15 = vld [vmem:[#allocation2 + $0x1e8] sm:$0xff]  ;;  %v1170_v16 = vld [vmem:[%s1468_s0 + $0x30] sm:$0xff]  ;;  %v380_v17 = vld [vmem:[#allocation2 + $0x60] sm:$0xff] }
  0x3c   :  { %328 = vmatpush.msrb.mxu2 %v175_v30  ;;  %347 = vmatpush.msrb.mxu3 %v192_v31  ;;  %v397_v18 = vld [vmem:[#allocation2 + $0xe8] sm:$0xff]  ;;  %v411_v19 = vld [vmem:[#allocation2 + $0x158] sm:$0xff]  ;;  %v428_v20 = vld [vmem:[#allocation2 + $0x1e0] sm:$0xff] }
  0x3d   :  { %288 = vmatpush.msrb.mxu0 %v143_v32  ;;  %307 = vmatpush.msrb.mxu1 %v160_v33  ;;  %v1175_v21 = vld [vmem:[%s1468_s0 + $0x20] sm:$0xff]  ;;  %v1181_v22 = vld [vmem:[%s1468_s0 + $0x38] sm:$0xff]  ;;  %v410_v25 = vld [vmem:[#allocation2 + $0x150] sm:$0xff] }
  0x3e   :  { %329 = vmatpush.msrb.mxu2 %v174_v34  ;;  %348 = vmatpush.msrb.mxu3 %v191_v35  ;;  %v379_v23 = vld [vmem:[#allocation2 + $0x58] sm:$0xff]  ;;  %v396_v24 = vld [vmem:[#allocation2 + $0xe0] sm:$0xff]  ;;  %v1187_v27 = vld [vmem:[%s1468_s0 + $0x28] sm:$0xff] }
  0x3f   :  { %289 = vmatpush.msrb.mxu0 %v142_v36  ;;  %308 = vmatpush.msrb.mxu1 %v159_v37  ;;  %v427_v26 = vld [vmem:[#allocation2 + $0x1d8] sm:$0xff]  ;;  %v378_v28 = vld [vmem:[#allocation2 + $0x50] sm:$0xff]  ;;  %v409_v30 = vld [vmem:[#allocation2 + $0x148] sm:$0xff] }
  0x40   :  { %330 = vmatpush.msrb.mxu2 %v173_v38  ;;  %349 = vmatpush.msrb.mxu3 %v190_v39  ;;  %v395_v29 = vld [vmem:[#allocation2 + $0xd8] sm:$0xff]  ;;  %v426_v31 = vld [vmem:[#allocation2 + $0x1d0] sm:$0xff]  ;;  %v377_v32 = vld [vmem:[#allocation2 + $0x48] sm:$0xff] }
  0x41   :  { %290 = vmatpush.msrb.mxu0 %v141_v40  ;;  %309 = vmatpush.msrb.mxu1 %v158_v41  ;;  %v394_v33 = vld [vmem:[#allocation2 + $0xd0] sm:$0xff]  ;;  %v408_v34 = vld [vmem:[#allocation2 + $0x140] sm:$0xff]  ;;  %v425_v35 = vld [vmem:[#allocation2 + $0x1c8] sm:$0xff] }
  0x42   :  { %331 = vmatpush.msrb.mxu2 %v172_v42  ;;  %350 = vmatpush.msrb.mxu3 %v189_v43  ;;  %v376_v36 = vld [vmem:[#allocation2 + $0x40] sm:$0xff]  ;;  %v393_v37 = vld [vmem:[#allocation2 + $0xc8] sm:$0xff]  ;;  %v407_v38 = vld [vmem:[#allocation2 + $0x138] sm:$0xff] }
  0x43   :  { %291 = vmatpush.msrb.mxu0 %v140_v44  ;;  %310 = vmatpush.msrb.mxu1 %v157_v45  ;;  %v424_v39 = vld [vmem:[#allocation2 + $0x1c0] sm:$0xff]  ;;  %v375_v40 = vld [vmem:[#allocation2 + $0x38] sm:$0xff]  ;;  %v406_v42 = vld [vmem:[#allocation2 + $0x130] sm:$0xff] }
  0x44   :  { %332 = vmatpush.msrb.mxu2 %v171_v46  ;;  %351 = vmatpush.msrb.mxu3 %v188_v47  ;;  %v392_v41 = vld [vmem:[#allocation2 + $0xc0] sm:$0xff]  ;;  %v423_v43 = vld [vmem:[#allocation2 + $0x1b8] sm:$0xff]  ;;  %v374_v44 = vld [vmem:[#allocation2 + $0x30] sm:$0xff] }
  0x45   :  { %292 = vmatpush.msrb.mxu0 %v139_v48  ;;  %311 = vmatpush.msrb.mxu1 %v156_v49  ;;  %v391_v45 = vld [vmem:[#allocation2 + $0xb8] sm:$0xff]  ;;  %v405_v46 = vld [vmem:[#allocation2 + $0x128] sm:$0xff]  ;;  %v422_v47 = vld [vmem:[#allocation2 + $0x1b0] sm:$0xff] }
  0x46   :  { %333 = vmatpush.msrb.mxu2 %v170_v50  ;;  %352 = vmatpush.msrb.mxu3 %v187_v51  ;;  %v373_v48 = vld [vmem:[#allocation2 + $0x28] sm:$0xff]  ;;  %v390_v49 = vld [vmem:[#allocation2 + $0xb0] sm:$0xff]  ;;  %v404_v50 = vld [vmem:[#allocation2 + $0x120] sm:$0xff] }
  0x47   :  { %293 = vmatpush.msrb.mxu0 %v138_v52  ;;  %312 = vmatpush.msrb.mxu1 %v155_v53  ;;  %v421_v51 = vld [vmem:[#allocation2 + $0x1a8] sm:$0xff]  ;;  %v372_v52 = vld [vmem:[#allocation2 + $0x20] sm:$0xff] }
  0x48   :  { %334 = vmatpush.msrb.mxu2 %v169_v54  ;;  %353 = vmatpush.msrb.mxu3 %v186_v55  ;;  %v389_v53 = vld [vmem:[#allocation2 + $0xa8] sm:$0xff]  ;;  %v403_v54 = vld [vmem:[#allocation2 + $0x118] sm:$0xff]  ;;  %v420_v55 = vld [vmem:[#allocation2 + $0x1a0] sm:$0xff] }
  0x49   :  { %294 = vmatpush.msrb.mxu0 %v137_v56  ;;  %313 = vmatpush.msrb.mxu1 %v154_v57  ;;  %v371_v56 = vld [vmem:[#allocation2 + $0x18] sm:$0xff]  ;;  %v388_v57 = vld [vmem:[#allocation2 + $0xa0] sm:$0xff] }
  0x4a   :  { %335 = vmatpush.msrb.mxu2 %v168_v58  ;;  %354 = vmatpush.msrb.mxu3 %v185_v59  ;;  %v402_v58 = vld [vmem:[#allocation2 + $0x110] sm:$0xff]  ;;  %v419_v59 = vld [vmem:[#allocation2 + $0x198] sm:$0xff] }
  0x4b   :  { %256 = vmatmul.f32.vlgmr.msra.gmra.mxu2 %v1146_v60  ;;  %295 = vmatpush.msrb.mxu0 %v136_v61  ;;  %v370_v61 = vld [vmem:[#allocation2 + $0x10] sm:$0xff] }
  0x4c   :  { %536 = vmatpush.msra.mxu2 %v415_v62  ;;  %314 = vmatpush.msrb.mxu1 %v153_v63  ;;  %v387_v62 = vld [vmem:[#allocation2 + $0x98] sm:$0xff]  ;;  %v401_v63 = vld [vmem:[#allocation2 + $0x108] sm:$0xff] }
  0x4d   :  { %355 = vmatpush.msrb.mxu3 %v184_v0  ;;  %216 = vmatmul.f32.vlgmr.msra.gmra.mxu0 %v1151_v1  ;;  %v418_v0 = vld [vmem:[#allocation2 + $0x190] sm:$0xff] }
  0x4e   :  { %276 = vmatmul.f32.vlgmr.msra.gmra.mxu3 %v1157_v2  ;;  %496 = vmatpush.msra.mxu0 %v383_v3  ;;  %v369_v3 = vld [vmem:[#allocation2 + $0x8] sm:$0xff] }
  0x4f   :  { %537 = vmatpush.msra.mxu2 %v414_v4  ;;  %556 = vmatpush.msra.mxu3 %v431_v5  ;;  %v386_v4 = vld [vmem:[#allocation2 + $0x90] sm:$0xff]  ;;  %v400_v5 = vld [vmem:[#allocation2 + $0x100] sm:$0xff] }
  0x50   :  { %315 = vmatpush.msrb.mxu1 %v152_v6  ;;  %497 = vmatpush.msra.mxu0 %v382_v7  ;;  %v417_v6 = vld [vmem:[#allocation2 + $0x188] sm:$0xff]  ;;  %v479_v7 = vld [vmem:[#allocation2 + $0x378] sm:$0xff] }
  0x51   :  { %236 = vmatmul.f32.vlgmr.msra.gmra.mxu1 %v1164_v8  ;;  %538 = vmatpush.msra.mxu2 %v413_v9  ;;  %v368_v9 = vld [vmem:[#allocation2] sm:$0xff] }
  0x52   :  { %516 = vmatpush.msra.mxu1 %v399_v10  ;;  %557 = vmatpush.msra.mxu3 %v430_v11  ;;  %v385_v10 = vld [vmem:[#allocation2 + $0x88] sm:$0xff]  ;;  %v416_v11 = vld [vmem:[#allocation2 + $0x180] sm:$0xff] }
  0x53   :  { %498 = vmatpush.msra.mxu0 %v381_v12  ;;  %539 = vmatpush.msra.mxu2 %v412_v13  ;;  %v447_v12 = vld [vmem:[#allocation2 + $0x278] sm:$0xff]  ;;  %v478_v13 = vld [vmem:[#allocation2 + $0x370] sm:$0xff] }
  0x54   :  { %517 = vmatpush.msra.mxu1 %v398_v14  ;;  %558 = vmatpush.msra.mxu3 %v429_v15  ;;  %v495_v14 = vld [vmem:[#allocation2 + $0x3f8] sm:$0xff]  ;;  %v384_v15 = vld [vmem:[#allocation2 + $0x80] sm:$0xff] }
  0x55   :  { %336 = vmatmul.f32.vlgmr.msrb.gmra.mxu2 %v1170_v16  ;;  %499 = vmatpush.msra.mxu0 %v380_v17  ;;  %v446_v17 = vld [vmem:[#allocation2 + $0x270] sm:$0xff] }
  0x56   :  { %518 = vmatpush.msra.mxu1 %v397_v18  ;;  %540 = vmatpush.msra.mxu2 %v411_v19  ;;  %v463_v18 = vld [vmem:[#allocation2 + $0x2f8] sm:$0xff]  ;;  %v477_v19 = vld [vmem:[#allocation2 + $0x368] sm:$0xff] }
  0x57   :  { %559 = vmatpush.msra.mxu3 %v428_v20  ;;  %296 = vmatmul.f32.vlgmr.msrb.gmra.mxu0 %v1175_v21  ;;  %v494_v20 = vld [vmem:[#allocation2 + $0x3f0] sm:$0xff] }
  0x58   :  { %356 = vmatmul.f32.vlgmr.msrb.gmra.mxu3 %v1181_v22  ;;  %500 = vmatpush.msra.mxu0 %v379_v23  ;;  %v445_v23 = vld [vmem:[#allocation2 + $0x268] sm:$0xff] }
  0x59   :  { %519 = vmatpush.msra.mxu1 %v396_v24  ;;  %541 = vmatpush.msra.mxu2 %v410_v25  ;;  %v462_v24 = vld [vmem:[#allocation2 + $0x2f0] sm:$0xff]  ;;  %v476_v25 = vld [vmem:[#allocation2 + $0x360] sm:$0xff] }
  0x5a   :  { %560 = vmatpush.msra.mxu3 %v427_v26  ;;  %316 = vmatmul.f32.vlgmr.msrb.gmra.mxu1 %v1187_v27  ;;  %v493_v26 = vld [vmem:[#allocation2 + $0x3e8] sm:$0xff] }
  0x5b   :  { %501 = vmatpush.msra.mxu0 %v378_v28  ;;  %520 = vmatpush.msra.mxu1 %v395_v29  ;;  %v444_v28 = vld [vmem:[#allocation2 + $0x260] sm:$0xff]  ;;  %v461_v29 = vld [vmem:[#allocation2 + $0x2e8] sm:$0xff] }
  0x5c   :  { %542 = vmatpush.msra.mxu2 %v409_v30  ;;  %561 = vmatpush.msra.mxu3 %v426_v31  ;;  %v475_v30 = vld [vmem:[#allocation2 + $0x358] sm:$0xff]  ;;  %v492_v31 = vld [vmem:[#allocation2 + $0x3e0] sm:$0xff] }
  0x5d   :  { %502 = vmatpush.msra.mxu0 %v377_v32  ;;  %521 = vmatpush.msra.mxu1 %v394_v33  ;;  %v443_v32 = vld [vmem:[#allocation2 + $0x258] sm:$0xff]  ;;  %v460_v33 = vld [vmem:[#allocation2 + $0x2e0] sm:$0xff] }
  0x5e   :  { %543 = vmatpush.msra.mxu2 %v408_v34  ;;  %562 = vmatpush.msra.mxu3 %v425_v35  ;;  %v474_v34 = vld [vmem:[#allocation2 + $0x350] sm:$0xff]  ;;  %v491_v35 = vld [vmem:[#allocation2 + $0x3d8] sm:$0xff] }
  0x5f   :  { %503 = vmatpush.msra.mxu0 %v376_v36  ;;  %522 = vmatpush.msra.mxu1 %v393_v37  ;;  %v442_v36 = vld [vmem:[#allocation2 + $0x250] sm:$0xff]  ;;  %v459_v37 = vld [vmem:[#allocation2 + $0x2d8] sm:$0xff] }
  0x60   :  { %544 = vmatpush.msra.mxu2 %v407_v38  ;;  %563 = vmatpush.msra.mxu3 %v424_v39  ;;  %v473_v38 = vld [vmem:[#allocation2 + $0x348] sm:$0xff]  ;;  %v490_v39 = vld [vmem:[#allocation2 + $0x3d0] sm:$0xff] }
  0x61   :  { %504 = vmatpush.msra.mxu0 %v375_v40  ;;  %523 = vmatpush.msra.mxu1 %v392_v41  ;;  %v441_v40 = vld [vmem:[#allocation2 + $0x248] sm:$0xff]  ;;  %v458_v41 = vld [vmem:[#allocation2 + $0x2d0] sm:$0xff] }
  0x62   :  { %545 = vmatpush.msra.mxu2 %v406_v42  ;;  %564 = vmatpush.msra.mxu3 %v423_v43  ;;  %v472_v42 = vld [vmem:[#allocation2 + $0x340] sm:$0xff]  ;;  %v489_v43 = vld [vmem:[#allocation2 + $0x3c8] sm:$0xff] }
  0x63   :  { %505 = vmatpush.msra.mxu0 %v374_v44  ;;  %524 = vmatpush.msra.mxu1 %v391_v45  ;;  %v440_v44 = vld [vmem:[#allocation2 + $0x240] sm:$0xff]  ;;  %v457_v45 = vld [vmem:[#allocation2 + $0x2c8] sm:$0xff] }
  0x64   :  { %546 = vmatpush.msra.mxu2 %v405_v46  ;;  %565 = vmatpush.msra.mxu3 %v422_v47  ;;  %v471_v46 = vld [vmem:[#allocation2 + $0x338] sm:$0xff]  ;;  %v488_v47 = vld [vmem:[#allocation2 + $0x3c0] sm:$0xff] }
  0x65   :  { %506 = vmatpush.msra.mxu0 %v373_v48  ;;  %525 = vmatpush.msra.mxu1 %v390_v49  ;;  %v439_v48 = vld [vmem:[#allocation2 + $0x238] sm:$0xff]  ;;  %v456_v49 = vld [vmem:[#allocation2 + $0x2c0] sm:$0xff] }
  0x66   :  { %547 = vmatpush.msra.mxu2 %v404_v50  ;;  %566 = vmatpush.msra.mxu3 %v421_v51  ;;  %v470_v50 = vld [vmem:[#allocation2 + $0x330] sm:$0xff]  ;;  %v487_v51 = vld [vmem:[#allocation2 + $0x3b8] sm:$0xff] }
  0x67   :  { %507 = vmatpush.msra.mxu0 %v372_v52  ;;  %526 = vmatpush.msra.mxu1 %v389_v53  ;;  %v438_v52 = vld [vmem:[#allocation2 + $0x230] sm:$0xff]  ;;  %v455_v53 = vld [vmem:[#allocation2 + $0x2b8] sm:$0xff] }
  0x68   :  { %548 = vmatpush.msra.mxu2 %v403_v54  ;;  %567 = vmatpush.msra.mxu3 %v420_v55  ;;  %v469_v54 = vld [vmem:[#allocation2 + $0x328] sm:$0xff]  ;;  %v486_v55 = vld [vmem:[#allocation2 + $0x3b0] sm:$0xff] }
  0x69   :  { %508 = vmatpush.msra.mxu0 %v371_v56  ;;  %527 = vmatpush.msra.mxu1 %v388_v57  ;;  %v437_v56 = vld [vmem:[#allocation2 + $0x228] sm:$0xff]  ;;  %v454_v57 = vld [vmem:[#allocation2 + $0x2b0] sm:$0xff] }
  0x6a   :  { %549 = vmatpush.msra.mxu2 %v402_v58  ;;  %568 = vmatpush.msra.mxu3 %v419_v59  ;;  %v362_v58 = vand.u32 2147483647, %v1146_v60  ;;  %v468_v59 = vld [vmem:[#allocation2 + $0x320] sm:$0xff]  ;;  %v435_v60 = vld [vmem:[#allocation2 + $0x218] sm:$0xff] }
  0x6b   :  { %509 = vmatpush.msra.mxu0 %v370_v61  ;;  %528 = vmatpush.msra.mxu1 %v387_v62  ;;  %v485_v61 = vld [vmem:[#allocation2 + $0x3a8] sm:$0xff]  ;;  %v436_v62 = vld [vmem:[#allocation2 + $0x220] sm:$0xff] }
  0x6c   :  { %550 = vmatpush.msra.mxu2 %v401_v63  ;;  %569 = vmatpush.msra.mxu3 %v418_v0  ;;  %v360_v63 = vand.u32 2147483647, %v1151_v1  ;;  %v453_v0 = vld [vmem:[#allocation2 + $0x2a8] sm:$0xff]  ;;  %v483_v1 = vld [vmem:[#allocation2 + $0x398] sm:$0xff] }
  0x6d   :  { %510 = vmatpush.msra.mxu0 %v369_v3  ;;  %529 = vmatpush.msra.mxu1 %v386_v4  ;;  %v467_v3 = vld [vmem:[#allocation2 + $0x318] sm:$0xff]  ;;  %v363_v4 = vand.u32 2147483647, %v1157_v2  ;;  %v465_v2 = vld [vmem:[#allocation2 + $0x308] sm:$0xff] }
  0x6e   :  { %551 = vmatpush.msra.mxu2 %v400_v5  ;;  %570 = vmatpush.msra.mxu3 %v417_v6  ;;  %v484_v5 = vld [vmem:[#allocation2 + $0x3a0] sm:$0xff]  ;;  %v361_v6 = vand.u32 2147483647, %v1164_v8  ;;  %v366_v8 = vand.u32 2147483647, %v1170_v16 }
  0x6f   :  { %511 = vmatpush.msra.mxu0 %v368_v9  ;;  %530 = vmatpush.msra.mxu1 %v385_v10  ;;  %v466_v9 = vld [vmem:[#allocation2 + $0x310] sm:$0xff]  ;;  %v480_v16 = vld [vmem:[#allocation2 + $0x380] sm:$0xff] }
  0x70   :  { %616 = vmatpush.msrb.mxu2 %v479_v7  ;;  %571 = vmatpush.msra.mxu3 %v416_v11  ;;  %v452_v7 = vld [vmem:[#allocation2 + $0x2a0] sm:$0xff]  ;;  %v434_v10 = vld [vmem:[#allocation2 + $0x210] sm:$0xff]  ;;  %v451_v11 = vld [vmem:[#allocation2 + $0x298] sm:$0xff] }
  0x71   :  { %576 = vmatpush.msrb.mxu0 %v447_v12  ;;  %531 = vmatpush.msra.mxu1 %v384_v15  ;;  %v482_v12 = vld [vmem:[#allocation2 + $0x390] sm:$0xff]  ;;  %v464_v15 = vld [vmem:[#allocation2 + $0x300] sm:$0xff] }
  0x72   :  { %617 = vmatpush.msrb.mxu2 %v478_v13  ;;  %636 = vmatpush.msrb.mxu3 %v495_v14  ;;  %v433_v13 = vld [vmem:[#allocation2 + $0x208] sm:$0xff]  ;;  %v450_v14 = vld [vmem:[#allocation2 + $0x290] sm:$0xff] }
  0x73   :  { %577 = vmatpush.msrb.mxu0 %v446_v17  ;;  %596 = vmatpush.msrb.mxu1 %v463_v18  ;;  %v481_v17 = vld [vmem:[#allocation2 + $0x388] sm:$0xff]  ;;  %v432_v18 = vld [vmem:[#allocation2 + $0x200] sm:$0xff] }
  0x74   :  { %618 = vmatpush.msrb.mxu2 %v477_v19  ;;  %637 = vmatpush.msrb.mxu3 %v494_v20  ;;  %v364_v19 = vand.u32 2147483647, %v1175_v21  ;;  %v760_v20 = vld [vmem:[%s1473_s5 + $0xf8] sm:$0xff]  ;;  %v365_v21 = vand.u32 2147483647, %v1187_v27  ;;  %v775_v27 = vld [vmem:[%s1473_s5 + $0x170] sm:$0xff] }
  0x75   :  { %578 = vmatpush.msrb.mxu0 %v445_v23  ;;  %597 = vmatpush.msrb.mxu1 %v462_v24  ;;  %v449_v23 = vld [vmem:[#allocation2 + $0x288] sm:$0xff]  ;;  %v367_v24 = vand.u32 2147483647, %v1181_v22 }
  0x76   :  { %619 = vmatpush.msrb.mxu2 %v476_v25  ;;  %638 = vmatpush.msrb.mxu3 %v493_v26  ;;  %v759_v25 = vld [vmem:[%s1473_s5 + $0xf0] sm:$0xff]  ;;  %v776_v26 = vld [vmem:[%s1473_s5 + $0x178] sm:$0xff]  ;;  %v758_v22 = vld [vmem:[%s1473_s5 + $0xe8] sm:$0xff] }
  0x77   :  { %579 = vmatpush.msrb.mxu0 %v444_v28  ;;  %598 = vmatpush.msrb.mxu1 %v461_v29  ;;  %v448_v28 = vld [vmem:[#allocation2 + $0x280] sm:$0xff]  ;;  %v744_v29 = vld [vmem:[%s1473_s5 + $0x78] sm:$0xff] }
  0x78   :  { %620 = vmatpush.msrb.mxu2 %v475_v30  ;;  %639 = vmatpush.msrb.mxu3 %v492_v31  ;;  %v757_v30 = vld [vmem:[%s1473_s5 + $0xe0] sm:$0xff]  ;;  %v743_v31 = vld [vmem:[%s1473_s5 + $0x70] sm:$0xff] }
  0x79   :  { %580 = vmatpush.msrb.mxu0 %v443_v32  ;;  %599 = vmatpush.msrb.mxu1 %v460_v33  ;;  %v774_v32 = vld [vmem:[%s1473_s5 + $0x168] sm:$0xff]  ;;  %v756_v33 = vld [vmem:[%s1473_s5 + $0xd8] sm:$0xff] }
  0x7a   :  { %621 = vmatpush.msrb.mxu2 %v474_v34  ;;  %640 = vmatpush.msrb.mxu3 %v491_v35  ;;  %v742_v34 = vld [vmem:[%s1473_s5 + $0x68] sm:$0xff]  ;;  %v773_v35 = vld [vmem:[%s1473_s5 + $0x160] sm:$0xff] }
  0x7b   :  { %581 = vmatpush.msrb.mxu0 %v442_v36  ;;  %600 = vmatpush.msrb.mxu1 %v459_v37  ;;  %v755_v36 = vld [vmem:[%s1473_s5 + $0xd0] sm:$0xff]  ;;  %v741_v37 = vld [vmem:[%s1473_s5 + $0x60] sm:$0xff] }
  0x7c   :  { %622 = vmatpush.msrb.mxu2 %v473_v38  ;;  %641 = vmatpush.msrb.mxu3 %v490_v39  ;;  %v772_v38 = vld [vmem:[%s1473_s5 + $0x158] sm:$0xff]  ;;  %v754_v39 = vld [vmem:[%s1473_s5 + $0xc8] sm:$0xff] }
  0x7d   :  { %582 = vmatpush.msrb.mxu0 %v441_v40  ;;  %601 = vmatpush.msrb.mxu1 %v458_v41  ;;  %v740_v40 = vld [vmem:[%s1473_s5 + $0x58] sm:$0xff]  ;;  %v771_v41 = vld [vmem:[%s1473_s5 + $0x150] sm:$0xff] }
  0x7e   :  { %623 = vmatpush.msrb.mxu2 %v472_v42  ;;  %642 = vmatpush.msrb.mxu3 %v489_v43  ;;  %v753_v42 = vld [vmem:[%s1473_s5 + $0xc0] sm:$0xff]  ;;  %v739_v43 = vld [vmem:[%s1473_s5 + $0x50] sm:$0xff] }
  0x7f   :  { %583 = vmatpush.msrb.mxu0 %v440_v44  ;;  %602 = vmatpush.msrb.mxu1 %v457_v45  ;;  %v770_v44 = vld [vmem:[%s1473_s5 + $0x148] sm:$0xff]  ;;  %v752_v45 = vld [vmem:[%s1473_s5 + $0xb8] sm:$0xff] }
  0x80   :  { %624 = vmatpush.msrb.mxu2 %v471_v46  ;;  %643 = vmatpush.msrb.mxu3 %v488_v47  ;;  %v738_v46 = vld [vmem:[%s1473_s5 + $0x48] sm:$0xff]  ;;  %v769_v47 = vld [vmem:[%s1473_s5 + $0x140] sm:$0xff] }
  0x81   :  { %584 = vmatpush.msrb.mxu0 %v439_v48  ;;  %603 = vmatpush.msrb.mxu1 %v456_v49  ;;  %v751_v48 = vld [vmem:[%s1473_s5 + $0xb0] sm:$0xff]  ;;  %v737_v49 = vld [vmem:[%s1473_s5 + $0x40] sm:$0xff] }
  0x82   :  { %625 = vmatpush.msrb.mxu2 %v470_v50  ;;  %644 = vmatpush.msrb.mxu3 %v487_v51  ;;  %v768_v50 = vld [vmem:[%s1473_s5 + $0x138] sm:$0xff]  ;;  %v750_v51 = vld [vmem:[%s1473_s5 + $0xa8] sm:$0xff] }
  0x83   :  { %585 = vmatpush.msrb.mxu0 %v438_v52  ;;  %604 = vmatpush.msrb.mxu1 %v455_v53  ;;  %v736_v52 = vld [vmem:[%s1473_s5 + $0x38] sm:$0xff]  ;;  %v767_v53 = vld [vmem:[%s1473_s5 + $0x130] sm:$0xff] }
  0x84   :  { %626 = vmatpush.msrb.mxu2 %v469_v54  ;;  %645 = vmatpush.msrb.mxu3 %v486_v55  ;;  %v749_v54 = vld [vmem:[%s1473_s5 + $0xa0] sm:$0xff]  ;;  %v735_v55 = vld [vmem:[%s1473_s5 + $0x30] sm:$0xff] }
  0x85   :  { %586 = vmatpush.msrb.mxu0 %v437_v56  ;;  %605 = vmatpush.msrb.mxu1 %v454_v57  ;;  %v766_v56 = vld [vmem:[%s1473_s5 + $0x128] sm:$0xff]  ;;  %v748_v57 = vld [vmem:[%s1473_s5 + $0x98] sm:$0xff] }
  0x86   :  { %627 = vmatpush.msrb.mxu2 %v468_v59  ;;  %646 = vmatpush.msrb.mxu3 %v485_v61  ;;  %v765_v59 = vld [vmem:[%s1473_s5 + $0x120] sm:$0xff]  ;;  %v747_v61 = vld [vmem:[%s1473_s5 + $0x90] sm:$0xff] }
  0x87   :  { %552 = vmatmul.f32.vlgmr.msra.gmra.mxu2 %v362_v58  ;;  %587 = vmatpush.msrb.mxu0 %v436_v62  ;;  %v734_v58 = vld [vmem:[%s1473_s5 + $0x28] sm:$0xff]  ;;  %v733_v62 = vld [vmem:[%s1473_s5 + $0x20] sm:$0xff] }
  0x88   :  { %606 = vmatpush.msrb.mxu1 %v453_v0  ;;  %628 = vmatpush.msrb.mxu2 %v467_v3  ;;  %v746_v0 = vld [vmem:[%s1473_s5 + $0x88] sm:$0xff]  ;;  %v732_v3 = vld [vmem:[%s1473_s5 + $0x18] sm:$0xff] }
  0x89   :  { %647 = vmatpush.msrb.mxu3 %v484_v5  ;;  %512 = vmatmul.f32.vlgmr.msra.gmra.mxu0 %v360_v63  ;;  %v764_v63 = vld [vmem:[%s1473_s5 + $0x118] sm:$0xff]  ;;  %v745_v5 = vld [vmem:[%s1473_s5 + $0x80] sm:$0xff] }
  0x8a   :  { %572 = vmatmul.f32.vlgmr.msra.gmra.mxu3 %v363_v4  ;;  %588 = vmatpush.msrb.mxu0 %v435_v60  ;;  %v763_v4 = vld [vmem:[%s1473_s5 + $0x110] sm:$0xff] }
  0x8b   :  { %607 = vmatpush.msrb.mxu1 %v452_v7  ;;  %629 = vmatpush.msrb.mxu2 %v466_v9  ;;  %v731_v60 = vld [vmem:[%s1473_s5 + $0x10] sm:$0xff]  ;;  %v727_v7 = vld [vmem:[%s1469_s1 + $0x8] sm:$0xff] }
  0x8c   :  { %648 = vmatpush.msrb.mxu3 %v483_v1  ;;  %532 = vmatmul.f32.vlgmr.msra.gmra.mxu1 %v361_v6  ;;  %v762_v6 = vld [vmem:[%s1473_s5 + $0x108] sm:$0xff]  ;;  %v761_v1 = vld [vmem:[%s1473_s5 + $0x100] sm:$0xff] }
  0x8d   :  { %589 = vmatpush.msrb.mxu0 %v434_v10  ;;  %608 = vmatpush.msrb.mxu1 %v451_v11  ;;  %v730_v9 = vld [vmem:[%s1473_s5 + $0x8] sm:$0xff]  ;;  %v728_v10 = vld [vmem:[%s1469_s1 + $0x10] sm:$0xff]  ;;  %v729_v11 = vld [vmem:[%s1473_s5] sm:$0xff] }
  0x8e   :  { %630 = vmatpush.msrb.mxu2 %v465_v2  ;;  %649 = vmatpush.msrb.mxu3 %v482_v12  ;;  %v726_v2 = vld [vmem:[%s1469_s1] sm:$0xff]  ;;  %v674_v12 = vld [vmem:[%s1472_s4 + $0x78] sm:$0xff]  ;;  %s1080_s1 = smov 112  }
  0x8f   :  { %590 = vmatpush.msrb.mxu0 %v433_v13  ;;  %609 = vmatpush.msrb.mxu1 %v450_v14  ;;  %v673_v13 = vld [vmem:[%s1472_s4 + $0x70] sm:$0xff]  ;;  %v672_v14 = vld [vmem:[%s1472_s4 + $0x68] sm:$0xff] }
  0x90   :  { %631 = vmatpush.msrb.mxu2 %v464_v15  ;;  %650 = vmatpush.msrb.mxu3 %v481_v17  ;;  %v670_v15 = vld [vmem:[%s1472_s4 + $0x58] sm:$0xff]  ;;  %v669_v17 = vld [vmem:[%s1472_s4 + $0x50] sm:$0xff] }
  0x91   :  { %632 = vmatmul.f32.vlgmr.msrb.gmra.mxu2 %v366_v8  ;;  %591 = vmatpush.msrb.mxu0 %v432_v18  ;;  %v671_v8 = vld [vmem:[%s1472_s4 + $0x60] sm:$0xff]  ;;  %v668_v18 = vld [vmem:[%s1472_s4 + $0x48] sm:$0xff] }
  0x92   :  { %798 = vmatpush.msra.mxu2 %v760_v20  ;;  %610 = vmatpush.msrb.mxu1 %v449_v23 }
  0x93   :  { %651 = vmatpush.msrb.mxu3 %v480_v16  ;;  %592 = vmatmul.f32.vlgmr.msrb.gmra.mxu0 %v364_v19 }
  0x94   :  { %652 = vmatmul.f32.vlgmr.msrb.gmra.mxu3 %v367_v24  ;;  %799 = vmatpush.msra.mxu2 %v759_v25 }
  0x95   :  { %818 = vmatpush.msra.mxu3 %v776_v26  ;;  %611 = vmatpush.msrb.mxu1 %v448_v28 }
  0x96   :  { %612 = vmatmul.f32.vlgmr.msrb.gmra.mxu1 %v365_v21  ;;  %800 = vmatpush.msra.mxu2 %v758_v22 }
  0x97   :  { %778 = vmatpush.msra.mxu1 %v744_v29  ;;  %819 = vmatpush.msra.mxu3 %v775_v27 }
  0x98   :  { %801 = vmatpush.msra.mxu2 %v757_v30  ;;  %675 = vmatpush.msra.mxu0 %v674_v12 }
  0x99   :  { %779 = vmatpush.msra.mxu1 %v743_v31  ;;  %820 = vmatpush.msra.mxu3 %v774_v32 }
  0x9a   :  { %802 = vmatpush.msra.mxu2 %v756_v33  ;;  %676 = vmatpush.msra.mxu0 %v673_v13  ;;  %v667_v33 = vld [vmem:[%s1472_s4 + $0x40] sm:$0xff] }
  0x9b   :  { %780 = vmatpush.msra.mxu1 %v742_v34  ;;  %821 = vmatpush.msra.mxu3 %v773_v35  ;;  %v666_v34 = vld [vmem:[%s1472_s4 + $0x38] sm:$0xff]  ;;  %v665_v35 = vld [vmem:[%s1472_s4 + $0x30] sm:$0xff] }
  0x9c   :  { %803 = vmatpush.msra.mxu2 %v755_v36  ;;  %677 = vmatpush.msra.mxu0 %v672_v14  ;;  %v664_v36 = vld [vmem:[%s1472_s4 + $0x28] sm:$0xff] }
  0x9d   :  { %781 = vmatpush.msra.mxu1 %v741_v37  ;;  %822 = vmatpush.msra.mxu3 %v772_v38  ;;  %v663_v37 = vld [vmem:[%s1472_s4 + $0x20] sm:$0xff]  ;;  %v662_v38 = vld [vmem:[%s1472_s4 + $0x18] sm:$0xff] }
  0x9e   :  { %804 = vmatpush.msra.mxu2 %v754_v39  ;;  %678 = vmatpush.msra.mxu0 %v671_v8  ;;  %v661_v39 = vld [vmem:[%s1472_s4 + $0x10] sm:$0xff] }
  0x9f   :  { %782 = vmatpush.msra.mxu1 %v740_v40  ;;  %823 = vmatpush.msra.mxu3 %v771_v41  ;;  %v660_v40 = vld [vmem:[%s1472_s4 + $0x8] sm:$0xff]  ;;  %v659_v41 = vld [vmem:[%s1472_s4] sm:$0xff] }
  0xa0   :  { %805 = vmatpush.msra.mxu2 %v753_v42  ;;  %679 = vmatpush.msra.mxu0 %v670_v15 }
  0xa1   :  { %783 = vmatpush.msra.mxu1 %v739_v43  ;;  %824 = vmatpush.msra.mxu3 %v770_v44 }
  0xa2   :  { %806 = vmatpush.msra.mxu2 %v752_v45  ;;  %680 = vmatpush.msra.mxu0 %v669_v17 }
  0xa3   :  { %784 = vmatpush.msra.mxu1 %v738_v46  ;;  %825 = vmatpush.msra.mxu3 %v769_v47 }
  0xa4   :  { %807 = vmatpush.msra.mxu2 %v751_v48  ;;  %681 = vmatpush.msra.mxu0 %v668_v18 }
  0xa5   :  { %785 = vmatpush.msra.mxu1 %v737_v49  ;;  %826 = vmatpush.msra.mxu3 %v768_v50 }
  0xa6   :  { %808 = vmatpush.msra.mxu2 %v750_v51  ;;  %682 = vmatpush.msra.mxu0 %v667_v33  ;;  %v875_v33 = vld [vmem:[%s1474_s6 + $0x10] sm:$0xff] }
  0xa7   :  { %786 = vmatpush.msra.mxu1 %v736_v52  ;;  %827 = vmatpush.msra.mxu3 %v767_v53 }
  0xa8   :  { %809 = vmatpush.msra.mxu2 %v749_v54  ;;  %683 = vmatpush.msra.mxu0 %v666_v34  ;;  %v874_v34 = vld [vmem:[%s1474_s6 + $0x8] sm:$0xff] }
  0xa9   :  { %787 = vmatpush.msra.mxu1 %v735_v55  ;;  %828 = vmatpush.msra.mxu3 %v766_v56 }
  0xaa   :  { %810 = vmatpush.msra.mxu2 %v748_v57  ;;  %684 = vmatpush.msra.mxu0 %v665_v35  ;;  %v1077_v57 = vmov 1.0   ;;  %v873_v35 = vld [vmem:[%s1474_s6] sm:$0xff] }
  0xab   :  { %788 = vmatpush.msra.mxu1 %v734_v58  ;;  %829 = vmatpush.msra.mxu3 %v765_v59  ;;  %v1405_v58 = vld [vmem:[%s1476_s8] sm:$0xff]  ;;  %s1079_s8 = smov 120  }
  0xac   :  { %811 = vmatpush.msra.mxu2 %v747_v61  ;;  %685 = vmatpush.msra.mxu0 %v664_v36  ;;  %v777_v59 = vperm.slane %v1405_v58, 0 }
  0xad   :  { %789 = vmatpush.msra.mxu1 %v733_v62  ;;  %830 = vmatpush.msra.mxu3 %v764_v63 }
  0xae   :  { %812 = vmatpush.msra.mxu2 %v746_v0  ;;  %686 = vmatpush.msra.mxu0 %v663_v37 }
  0xaf   :  { %790 = vmatpush.msra.mxu1 %v732_v3  ;;  %831 = vmatpush.msra.mxu3 %v763_v4 }
  0xb0   :  { %813 = vmatpush.msra.mxu2 %v745_v5  ;;  %687 = vmatpush.msra.mxu0 %v662_v38 }
  0xb1   :  { %791 = vmatpush.msra.mxu1 %v731_v60  ;;  %832 = vmatpush.msra.mxu3 %v762_v6  ;;  %v1078_v60 = vmov 64.0  }
  0xb2   :  { %814 = vmatmul.f32.vlgmr.msra.gmra.mxu2 %v727_v7  ;;  %688 = vmatpush.msra.mxu0 %v661_v39  ;;  %1011 = vrcp.f32 %v1078_v60 }
  0xb3   :  { %792 = vmatpush.msra.mxu1 %v730_v9  ;;  %833 = vmatpush.msra.mxu3 %v761_v1 }
  0xb4   :  { %834 = vmatmul.f32.vlgmr.msra.gmra.mxu3 %v728_v10  ;;  %689 = vmatpush.msra.mxu0 %v660_v40 }
  0xb5   :  { %793 = vmatpush.msra.mxu1 %v729_v11 }
  0xb6   :  { %794 = vmatmul.f32.vlgmr.msra.gmra.mxu1 %v726_v2  ;;  %690 = vmatpush.msra.mxu0 %v659_v41 }
  0xb8   :  { %v1012_v7 = vpop.eup %1011 }
  0xb9   :  { %v843_v1 = vmul.f32 64.0, %v1012_v7  ;;  %vm847_vm5 = vweird.f32 %v1012_v7 }
  0xbb   :  { %v844_v10 = vsub.f32 1.0, %v843_v1  ;;  %v941_v1 = vld [vmem:[%s1475_s7 + $0x8] sm:$0xff] }
  0xbd   :  { %v845_v13 = vmul.f32 %v1012_v7, %v844_v10  ;;  %v940_v10 = vld [vmem:[%s1475_s7] sm:$0xff] }
  0xbf   :  { %v846_v18 = vadd.f32 %v1012_v7, %v845_v13 }
  0xca   :  { %v217_v19 = vpop.f32.mrf.mxu0 }
  0xce   :  { %v237_v20 = vpop.f32.mrf.mxu1  ;;  %v257_v23 = vpop.f32.mrf.mxu2 }
  0xcf   :  { %v238_v24 = vadd.f32 %v237_v20, %v217_v19 }
  0xd1   :  { %v258_v16 = vadd.f32 %v257_v23, %v238_v24  ;;  %v277_v25 = vpop.f32.mrf.mxu3  ;;  %v848_v24 = vsel %vm847_vm5, %v1012_v7, %v846_v18  ;;  %v943_v7 = vld [vmem:[%s1475_s7 + $0x18] sm:$0xff] }
  0xd2   :  { %960 = vmatpush.msrb.mxu1 %v943_v7 }
  0xd3   :  { %v278_v21 = vadd.f32 %v277_v25, %v258_v16 }
  0xd4   :  { %v297_v26 = vpop.f32.mrf.mxu0 }
  0xd5   :  { %v298_v28 = vadd.f32 %v297_v26, %v278_v21 }
  0xd7   :  { %v317_v22 = vpop.f32.mrf.mxu1 }
  0xd8   :  { %v318_v29 = vadd.f32 %v317_v22, %v298_v28  ;;  %v337_v27 = vpop.f32.mrf.mxu2 }
  0xda   :  { %v338_v30 = vadd.f32 %v337_v27, %v318_v29  ;;  %v880_v29 = vld [vmem:[%s1474_s6 + $0x38] sm:$0xff]  ;;  %v879_v27 = vld [vmem:[%s1474_s6 + $0x30] sm:$0xff] }
  0xdb   :  { %v357_v31 = vpop.f32.mrf.mxu3  ;;  %893 = vmatpush.msrb.mxu0 %v880_v29 }
  0xdc   :  { %v1373_v32 = vadd.f32 %v357_v31, %v338_v30  ;;  %v878_v30 = vld [vmem:[%s1474_s6 + $0x28] sm:$0xff]  ;;  %v877_v31 = vld [vmem:[%s1474_s6 + $0x20] sm:$0xff] }
  0xdd   :  { %894 = vmatpush.msrb.mxu0 %v879_v27 }
  0xdf   :  { %895 = vmatpush.msrb.mxu0 %v878_v30 }
  0xe1   :  { %896 = vmatpush.msrb.mxu0 %v877_v31 }
 0x106   :  { %v513_v42 = vpop.f32.mrf.mxu0 }
 0x109   :  { %v533_v43 = vpop.f32.mrf.mxu1 }
 0x10a   :  { %v534_v44 = vadd.f32 %v533_v43, %v513_v42  ;;  %v553_v45 = vpop.f32.mrf.mxu2 }
 0x10c   :  { %v554_v46 = vadd.f32 %v553_v45, %v534_v44  ;;  %v868_v45 = vperm.slane %v1405_v58, 1 }
 0x10d   :  { %v573_v47 = vpop.f32.mrf.mxu3 }
 0x10e   :  { %v574_v48 = vadd.f32 %v573_v47, %v554_v46 }
 0x110   :  { %v593_v49 = vpop.f32.mrf.mxu0 }
 0x111   :  { %v594_v50 = vadd.f32 %v593_v49, %v574_v48  ;;  %v870_v48 = vperm.slane %v1405_v58, 2 }
 0x113   :  { %v613_v51 = vpop.f32.mrf.mxu1 }
 0x114   :  { %v614_v52 = vadd.f32 %v613_v51, %v594_v50  ;;  %v633_v53 = vpop.f32.mrf.mxu2 }
 0x116   :  { %v634_v54 = vadd.f32 %v633_v53, %v614_v52  ;;  %v881_v52 = vperm.slane %v1405_v58, 3 }
 0x117   :  { %v653_v55 = vpop.f32.mrf.mxu3 }
 0x118   :  { %v654_v56 = vadd.f32 %v653_v55, %v634_v54 }
 0x11a   :  { %vm656_vm0 = vcmp.ne.f32.partialorder %v654_v56, 0.0  ;;  %v1082_v56 = vmov 32.0  }
 0x11b   :  { %996 = vmatmul.msk.f32.vlgmr.msra.gmra.mxu0 %vm656_vm0, %v1077_v57  ;;  %vm982_vm0 = vcmask 130048  }
 0x133   :  { %v795_v61 = vpop.f32.mrf.mxu1 }
 0x134   :  { %v796_v62 = vadd.f32 %v795_v61, %v777_v59 }
 0x135   :  { %v815_v63 = vpop.f32.mrf.mxu2 }
 0x136   :  { %v816_v0 = vadd.f32 %v815_v63, %v796_v62 }
 0x137   :  { %v835_v3 = vpop.f32.mrf.mxu3 }
 0x138   :  { %v836_v4 = vadd.f32 %v835_v3, %v816_v0 }
 0x13a   :  { %v839_v5 = vsel %vm838_vm1, %v836_v4, 0.0 }
 0x13b   :  { %840 = vadd.xlane.f32.xlu0 %v839_v5 }
 0x198   :  { %v692_v6 = vpop.f32.mrf.mxu0 }
 0x199   :  { %v695_v9 = vmax.f32 %v692_v6, 1.0 }
 0x19b   :  { %1013 = vrcp.f32 %v695_v9  ;;  %v707_v14 = vand.u32 2147483648, %v695_v9  ;;  %vm701_vm2 = vweird.f32 %v695_v9  ;;  %v705_v15 = vand.u32 2147483647, %v695_v9 }
 0x19d   :  { %v708_v19 = vor.u32 1.1754944e-38, %v707_v14  ;;  %vm706_vm6 = vcmp.eq.f32.partialorder %v705_v15, 8.507059e+37 }
 0x1a1   :  { %v1014_v11 = vpop.eup %1013 }
 0x1a2   :  { %v697_v2 = vmul.f32 %v1014_v11, %v695_v9  ;;  %vm702_vm3 = vweird.f32 %v1014_v11  ;;  %v942_v9 = vld [vmem:[%s1475_s7 + $0x10] sm:$0xff]  ;;  %s1083_s7 = smov 16  }
 0x1a3   :  { %vm703_vm4 = vmor %vm701_vm2, %vm702_vm3  ;;  %961 = vmatpush.msrb.mxu1 %v942_v9  ;;  %vm986_vm2 = vcmask 457728  }
 0x1a4   :  { %v698_v12 = vsub.f32 1.0, %v697_v2 }
 0x1a5   :  { %962 = vmatpush.msrb.mxu1 %v941_v1 }
 0x1a6   :  { %v699_v8 = vmul.f32 %v1014_v11, %v698_v12 }
 0x1a7   :  { %963 = vmatpush.msrb.mxu1 %v940_v10 }
 0x1a8   :  { %v700_v17 = vadd.f32 %v1014_v11, %v699_v8 }
 0x1aa   :  { %v704_v20 = vsel %vm703_vm4, %v1014_v11, %v700_v17 }
 0x1ab   :  { %v709_v23 = vsel %vm706_vm6, %v708_v19, %v704_v20  ;;  %v935_v19 = vperm.slane %v1405_v58, 4 }
 0x1ac   :  { %v1410_v16 = vmul.f32 %v709_v23, %v1373_v32  ;;  %v876_v32 = vld [vmem:[%s1474_s6 + $0x18] sm:$0xff] }
 0x1ad   :  { %897 = vmatpush.msrb.mxu0 %v876_v32  ;;  %v944_v32 = vperm.slane %v1405_v58, 6 }
 0x1ae   :  { %v841_v25 = vpop.xlane.xlu0 %840  ;;  %712 = vrot.lane.b32.xlu2 %v1410_v16, %s1079_s8 }
 0x1af   :  { %v849_v21 = vmul.f32 %v848_v24, %v841_v25  ;;  %898 = vmatpush.msrb.mxu0 %v875_v33 }
 0x1b1   :  { %v850_v26 = vsub.f32 %v836_v4, %v849_v21  ;;  %899 = vmatpush.msrb.mxu0 %v874_v34 }
 0x1b3   :  { %v851_v28 = vmul.f32 %v850_v26, %v850_v26  ;;  %900 = vmatpush.msrb.mxu0 %v873_v35 }
 0x1b5   :  { %v852_v22 = vsel %vm838_vm1, %v851_v28, 0.0 }
 0x1b6   :  { %853 = vadd.xlane.f32.xlu0 %v852_v22  ;;  %716 = vrot.lane.b32.xlu2 %v1410_v16, %s1080_s1 }
 0x1ca   :  { %720 = vrot.lane.b32.xlu0 %v1410_v16, %s1081_s29 }
 0x208   :  { %v713_v28 = vpop.permute.xlu2 %712 }
 0x209   :  { %v715_v29 = vadd.f32 %v713_v28, %v1410_v16 }
 0x210   :  { %v717_v22 = vpop.permute.xlu2 %716 }
 0x211   :  { %v719_v30 = vadd.f32 %v717_v22, %v715_v29 }
 0x229   :  { %v854_v36 = vpop.xlane.xlu0 %853 }
 0x22a   :  { %v855_v37 = vmul.f32 %v854_v36, %v848_v24  ;;  %v937_v24 = vperm.slane %v1405_v58, 5 }
 0x22c   :  { %v856_v38 = vadd.f32 1e-05, %v855_v37 }
 0x22e   :  { %1015 = vrsqrt.f32 %v856_v38  ;;  %vm863_vm8 = vweird.f32 %v856_v38 }
 0x22f   :  { %1017 = vrcp.f32 %v1082_v56 }
 0x234   :  { %v1016_v39 = vpop.eup %1015 }
 0x235   :  { %v858_v40 = vmul.f32 %v1016_v39, %v856_v38  ;;  %vm864_vm7 = vweird.f32 %v1016_v39  ;;  %v1018_v57 = vpop.eup %1017 }
 0x236   :  { %vm865_vm9 = vmor %vm863_vm8, %vm864_vm7  ;;  %v910_v59 = vmul.f32 32.0, %v1018_v57  ;;  %vm914_vm11 = vweird.f32 %v1018_v57 }
 0x237   :  { %v859_v41 = vmul.f32 %v1016_v39, %v858_v40 }
 0x238   :  { %v911_v61 = vsub.f32 1.0, %v910_v59 }
 0x239   :  { %v860_v42 = vmul.f32 0.5, %v859_v41 }
 0x23a   :  { %v912_v62 = vmul.f32 %v1018_v57, %v911_v61 }
 0x23b   :  { %v861_v43 = vsub.f32 1.5, %v860_v42 }
 0x23c   :  { %v913_v63 = vadd.f32 %v1018_v57, %v912_v62  ;;  %v721_v27 = vpop.permute.xlu0 %720 }
 0x23d   :  { %v862_v44 = vmul.f32 %v1016_v39, %v861_v43  ;;  %v723_v31 = vadd.f32 %v721_v27, %v719_v30 }
 0x23e   :  { %v915_v0 = vsel %vm914_vm11, %v1018_v57, %v913_v63 }
 0x23f   :  { %v866_v46 = vsel %vm865_vm9, %v1016_v39, %v862_v44  ;;  %v724_v34 = vmul.f32 0.25, %v723_v31 }
 0x240   :  { %v867_v47 = vmul.f32 %v866_v46, %v850_v26 }
 0x242   :  { %v869_v49 = vmul.f32 %v868_v45, %v867_v47 }
 0x244   :  { %v871_v50 = vadd.f32 %v870_v48, %v869_v49 }
 0x246   :  { %v872_v51 = vmax.f32 %v871_v50, 0.0 }
 0x248   :  { %997 = vmatmul.msk.f32.vlgmr.msrb.gmra.mxu0 %vm838_vm1, %v872_v51  ;;  %vm984_vm1 = vcmask 195584  }
 0x2c5   :  { %v902_v53 = vpop.f32.mrf.mxu0 }
 0x2c6   :  { %v903_v54 = vadd.f32 %v902_v53, %v881_v52 }
 0x2c8   :  { %v906_v55 = vsel %vm905_vm10, %v903_v54, 0.0 }
 0x2c9   :  { %907 = vadd.xlane.f32.xlu1 %v906_v55 }
 0x33c   :  { %v908_v3 = vpop.xlane.xlu1 %907 }
 0x33d   :  { %v916_v4 = vmul.f32 %v915_v0, %v908_v3 }
 0x33f   :  { %v917_v5 = vsub.f32 %v903_v54, %v916_v4 }
 0x341   :  { %v918_v60 = vmul.f32 %v917_v5, %v917_v5 }
 0x343   :  { %v919_v6 = vsel %vm905_vm10, %v918_v60, 0.0 }
 0x344   :  { %920 = vadd.xlane.f32.xlu1 %v919_v6 }
 0x3b7   :  { %v921_v11 = vpop.xlane.xlu1 %920 }
 0x3b8   :  { %v922_v2 = vmul.f32 %v921_v11, %v915_v0 }
 0x3ba   :  { %v923_v12 = vadd.f32 1e-05, %v922_v2 }
 0x3bc   :  { %1019 = vrsqrt.f32 %v923_v12  ;;  %vm930_vm13 = vweird.f32 %v923_v12 }
 0x3c2   :  { %v1020_v13 = vpop.eup %1019 }
 0x3c3   :  { %v925_v14 = vmul.f32 %v1020_v13, %v923_v12  ;;  %vm931_vm12 = vweird.f32 %v1020_v13 }
 0x3c4   :  { %vm932_vm14 = vmor %vm930_vm13, %vm931_vm12 }
 0x3c5   :  { %v926_v8 = vmul.f32 %v1020_v13, %v925_v14 }
 0x3c7   :  { %v927_v15 = vmul.f32 0.5, %v926_v8 }
 0x3c9   :  { %v928_v17 = vsub.f32 1.5, %v927_v15 }
 0x3cb   :  { %v929_v18 = vmul.f32 %v1020_v13, %v928_v17 }
 0x3cd   :  { %v933_v20 = vsel %vm932_vm14, %v1020_v13, %v929_v18 }
 0x3ce   :  { %v934_v23 = vmul.f32 %v933_v20, %v917_v5 }
 0x3d0   :  { %v936_v25 = vmul.f32 %v935_v19, %v934_v23 }
 0x3d2   :  { %v938_v21 = vadd.f32 %v937_v24, %v936_v25 }
 0x3d4   :  { %v939_v26 = vmax.f32 %v938_v21, 0.0 }
 0x3d6   :  { %998 = vmatmul.msk.f32.vlgmr.msrb.gmra.mxu1 %vm905_vm10, %v939_v26 }
 0x453   :  { %v965_v33 = vpop.f32.mrf.mxu1 }
 0x454   :  { %v966_v35 = vadd.f32 %v965_v33, %v944_v32 }
 0x456   :  { %v968_v36 = vadd.f32 %v966_v35, %v724_v34  ;;  %970 = vrot.lane.b32.xlu1 %v966_v35, %s1075_s18 }
 0x458   :  { %974 = vrot.lane.b32.xlu2 %v968_v36, %s1083_s7 }
 0x460   :  { %977 = vrot.lane.b32.xlu2 %v1410_v16, %s1084_s28 }
 0x4b2   :  { %v975_v37 = vpop.permute.xlu2 %974 }
 0x4ba   :  { %v978_v40 = vpop.permute.xlu2 %977 }
 0x4c8   :  { %v971_v38 = vpop.permute.xlu1 %970 }
 0x4c9   :  { %v981_v39 = vsel %vm980_vm15, %v724_v34, %v971_v38 }
 0x4ca   :  { %v983_v58 = vsel %vm982_vm0, %v981_v39, %v975_v37 }
 0x4cb   :  { %v985_v41 = vsel %vm984_vm1, %v983_v58, %v978_v40 }
 0x4cc   :  { %v987_v42 = vsel %vm986_vm2, %v985_v41, 0.0 }
 0x4cd   :  { %988 = vst [vmem:[%s1477_s9] sm:$0xff] %v987_v42 }
 0x4ce   :  { %993 = vsyncpa [#allocation3], 1 }
 0x4cf   :  { %994 = vsyncpa [#allocation5], 1 }

</bundles_post_ra>
